<compile_context>
chip_gen: v7x
topology: tpu7x:2x2x1
jax: 0.10.0
libtpu: 0.0.40
codegen_flags: <defaults>
</compile_context>

<pallas_src>
import jax
import jax.numpy as jnp
import numpy as np
from jax import lax
from jax.experimental import pallas as pl
from jax.experimental.pallas import tpu as pltpu

H_MAP, W_MAP = 8, 16            # noise_map_height / noise_map_width (small)
FEATURE_DIM = 128               # feature_dim
NF_HIDDEN = 128                 # synthetic NeuralField hidden width (lane-dense)
RES_HIDDEN = FEATURE_DIM // 4   # residual predictor hidden width (module spec: 32)
RES_HIDDEN_PAD = 128            # zero-padded hidden width used inside the kernel
CONST_TAIL_ROWS = 8             # bias / nf_w1 rows appended below noise_tokens


def _denoiser_kernel(raw_ref, coords_ref, const_ref, w_ref, out_ref):
    n, d = raw_ref.shape
    raw = raw_ref[...]          # (N, D) f32
    coords = coords_ref[...]    # (N, 2) f32

    # ---- unpack the f32 constant slab (noise map + biases + nf_w1 rows) ----
    noise = const_ref[0:n, :]                 # (N, D)
    tail = const_ref[n:n + CONST_TAIL_ROWS, :]  # (8, D), single band load
    nf_b1 = tail[0:1, :]
    nf_b2 = tail[1:2, :]
    rp_b1 = tail[2:3, :]
    rp_b2 = tail[3:4, :]
    rp_b3 = tail[4:5, :]
    nf_w1_r0 = tail[5:6, :]
    nf_w1_r1 = tail[6:7, :]

    # ---- NeuralField layer 1 (K=2): VPU broadcast-FMA instead of MXU ----
    h = jnp.maximum(
        coords[:, 0:1] * nf_w1_r0 + coords[:, 1:2] * nf_w1_r1 + nf_b1, 0.0)

    # ---- fused block-diagonal matmul: [h | raw] @ blkdiag(nf_w2, rp_w1) ----
    # One (N,256)@(256,256) bf16 matmul fills the 256-wide MXU; halves push
    # count vs. two independent 128^3 matmuls.  Exact: zero blocks give 0.
    lhs = jnp.concatenate(
        [h.astype(jnp.bfloat16), raw.astype(jnp.bfloat16)], axis=1)   # (N, 2D)
    fused = jnp.dot(lhs, w_ref[0:2 * d, :],
                    preferred_element_type=jnp.float32)               # (N, 2D) f32
    denoised = fused[:, 0:d] + nf_b2                                  # neural_field output
    r = jnp.maximum(fused[:, d:2 * d] + rp_b1, 0.0)                   # rp layer 1 (padded)

    # ---- residual predictor layers 2 & 3 (serial, hidden zero-padded) ----
    w23 = w_ref[2 * d:3 * d, :]                                       # (D, 2D) bf16
    r = jnp.maximum(
        jnp.dot(r.astype(jnp.bfloat16), w23[:, 0:d],
                preferred_element_type=jnp.float32) + rp_b2, 0.0)
    pred_residual = jnp.dot(r.astype(jnp.bfloat16), w23[:, d:2 * d],
                            preferred_element_type=jnp.float32) + rp_b3

    inv_elems = 1.0 / float(n * d)
    inv_rows = 1.0 / float(n)

    # residual_sparsity_loss first, so pred_residual dies before the loss pass.
    sparse_loss = 0.02 * (jnp.sum(jnp.abs(pred_residual)) * inv_elems)

    # pred_raw_vit_outputs = denoised + noise + pred_residual.detach()
    # (.detach() is a value no-op in the forward pass)
    pred = denoised + noise + pred_residual

    # ---- patch_l2_loss = F.mse_loss(pred, raw) ----
    diff = pred - raw
    l2 = jnp.sum(diff * diff) * inv_elems

    # ---- cosine_similarity_loss = 1 - cos_sim(pred, raw, dim=-1).mean() ----
    # Single fused rsqrt (EUP) replaces two sqrt + a divide; eps clamp squared
    # to keep parity with torch's max(||p||*||r||, eps).
    eps = 1e-8
    dot_pr = jnp.sum(pred * raw, axis=-1, keepdims=True)     # (N, 1)
    sum_p2 = jnp.sum(pred * pred, axis=-1, keepdims=True)
    sum_r2 = jnp.sum(raw * raw, axis=-1, keepdims=True)
    cos = dot_pr * lax.rsqrt(jnp.maximum(sum_p2 * sum_r2, eps * eps))
    cos_loss = 1.0 - jnp.sum(cos) * inv_rows

    # residual_loss: pred_residual - (raw - denoised - noise).detach() ==
    # pred - raw == diff, so residual_loss == 0.1 * patch_l2_loss (forward only).
    res_loss = 0.1 * l2
    total = l2 + cos_loss + res_loss + sparse_loss

    # All five scalars in ONE SMEM vector output (one writeback DMA).
    out_ref[0] = l2
    out_ref[1] = cos_loss
    out_ref[2] = res_loss
    out_ref[3] = sparse_loss
    out_ref[4] = total
    out_ref[5] = 0.0
    out_ref[6] = 0.0
    out_ref[7] = 0.0


def prepare_kernel_params(params):
    """One-time setup: token-major noise map + packed constant & weight slabs."""
    D = FEATURE_DIM
    h = RES_HIDDEN
    P = RES_HIDDEN_PAD
    f32 = jnp.float32

    noise_tokens = jnp.transpose(params["shared_artifacts"],
                                 (0, 2, 3, 1)).reshape(-1, D)

    # zero-pad the residual-predictor hidden width to 128 (lane-dense, exact)
    rp_w1 = jnp.zeros((D, P), f32).at[:, :h].set(params["rp_w1"])
    rp_w2 = jnp.zeros((P, P), f32).at[:h, :h].set(params["rp_w2"])
    rp_w3 = jnp.zeros((P, D), f32).at[:h, :].set(params["rp_w3"])
    rp_b1 = jnp.zeros((1, P), f32).at[:, :h].set(params["rp_b1"])
    rp_b2 = jnp.zeros((1, P), f32).at[:, :h].set(params["rp_b2"])

    # f32 constant slab: (N + 8, D) = noise_tokens stacked with bias / nf_w1 rows
    const_slab = jnp.concatenate([
        noise_tokens,
        params["nf_b1"], params["nf_b2"],
        rp_b1, rp_b2, params["rp_b3"],
        params["nf_w1"][0:1, :], params["nf_w1"][1:2, :],
        jnp.zeros((1, D), f32),
    ], axis=0)

    # bf16 weight slab: (3D, 2D)
    #   rows [0:2D]   = block_diag(nf_w2, rp_w1_pad)  -> fused 256-wide matmul
    #   rows [2D:3D]  = [rp_w2_pad | rp_w3_pad]
    w_a = (jnp.zeros((2 * D, 2 * D), f32)
           .at[:D, :D].set(params["nf_w2"])
           .at[D:, D:].set(rp_w1))
    w_bc = jnp.concatenate([rp_w2, rp_w3], axis=1)
    w_slab = jnp.concatenate([w_a, w_bc], axis=0).astype(jnp.bfloat16)

    return dict(const_slab=const_slab, w_slab=w_slab)


def single_image_denoiser_forward(raw_vit_outputs, pixel_coords, kparams):
    """Forward pass (3-D per-image input path, use_residual_predictor=True)."""
    D = FEATURE_DIM
    assert raw_vit_outputs.ndim == 3, \
        "only the 3-D (H, W, D) path is implemented (no grid_sample path)"
    raw = raw_vit_outputs.reshape(-1, D)
    coords = pixel_coords.reshape(-1, 2)

    vmem = pl.BlockSpec(memory_space=pltpu.MemorySpace.VMEM)
    smem = pl.BlockSpec(memory_space=pltpu.MemorySpace.SMEM)

    losses = pl.pallas_call(
        _denoiser_kernel,
        out_shape=jax.ShapeDtypeStruct((8,), jnp.float32),
        in_specs=[vmem, vmem, vmem, vmem],
        out_specs=smem,
    )(raw, coords, kparams["const_slab"], kparams["w_slab"])

    return {
        "patch_l2_loss": losses[0],
        "cosine_similarity_loss": losses[1],
        "residual_loss": losses[2],
        "residual_sparsity_loss": losses[3],
        "loss": losses[4],
    }


def reference_forward(raw_vit_outputs, pixel_coords, params):
    """Pure-JAX f32 reference mirroring the PyTorch module (unpadded weights)."""
    D = FEATURE_DIM
    raw = raw_vit_outputs.reshape(-1, D)
    coords = pixel_coords.reshape(-1, 2)
    noise = jnp.transpose(params["shared_artifacts"], (0, 2, 3, 1)).reshape(-1, D)

    h = jax.nn.relu(coords @ params["nf_w1"] + params["nf_b1"])
    denoised = h @ params["nf_w2"] + params["nf_b2"]

    r = jax.nn.relu(raw @ params["rp_w1"] + params["rp_b1"])
    r = jax.nn.relu(r @ params["rp_w2"] + params["rp_b2"])
    pred_residual = r @ params["rp_w3"] + params["rp_b3"]

    pred = denoised + noise + pred_residual
    l2 = jnp.mean((pred - raw) ** 2)
    eps = 1e-8
    cos = jnp.sum(pred * raw, -1) / jnp.maximum(
        jnp.linalg.norm(pred, axis=-1) * jnp.linalg.norm(raw, axis=-1), eps)
    cos_loss = 1.0 - jnp.mean(cos)
    res_loss = 0.1 * jnp.mean((pred_residual - (raw - denoised - noise)) ** 2)
    sparse_loss = 0.02 * jnp.mean(jnp.abs(pred_residual))
    return {
        "patch_l2_loss": l2,
        "cosine_similarity_loss": cos_loss,
        "residual_loss": res_loss,
        "residual_sparsity_loss": sparse_loss,
        "loss": l2 + cos_loss + res_loss + sparse_loss,
    }


def init_params(key):
    D = FEATURE_DIM
    ks = jax.random.split(key, 11)

    def lin(kw, kb, fan_in, fan_out):
        bound = 1.0 / np.sqrt(fan_in)
        w = jax.random.uniform(kw, (fan_in, fan_out), jnp.float32, -bound, bound)
        b = jax.random.uniform(kb, (1, fan_out), jnp.float32, -bound, bound)
        return w, b

    shared = 0.05 * jax.random.normal(ks[0], (1, D, H_MAP, W_MAP), jnp.float32)
    nf_w1, nf_b1 = lin(ks[1], ks[2], 2, NF_HIDDEN)
    nf_w2, nf_b2 = lin(ks[3], ks[4], NF_HIDDEN, D)
    rp_w1, rp_b1 = lin(ks[5], ks[6], D, RES_HIDDEN)
    rp_w2, rp_b2 = lin(ks[7], ks[8], RES_HIDDEN, RES_HIDDEN)
    rp_w3, rp_b3 = lin(ks[9], ks[10], RES_HIDDEN, D)
    return dict(shared_artifacts=shared,
                nf_w1=nf_w1, nf_b1=nf_b1, nf_w2=nf_w2, nf_b2=nf_b2,
                rp_w1=rp_w1, rp_b1=rp_b1, rp_w2=rp_w2, rp_b2=rp_b2,
                rp_w3=rp_w3, rp_b3=rp_b3)


if __name__ == "__main__":
    key = jax.random.PRNGKey(0)
    k_p, k_x, k_c = jax.random.split(key, 3)
    params = init_params(k_p)
    kparams = prepare_kernel_params(params)

    # raw_vit_outputs: (H, W, D) per-image ViT features; pixel_coords: (H, W, 2)
    raw_vit_outputs = jax.random.normal(k_x, (H_MAP, W_MAP, FEATURE_DIM), jnp.float32)
    pixel_coords = jax.random.uniform(k_c, (H_MAP, W_MAP, 2), jnp.float32, -1.0, 1.0)

    out = single_image_denoiser_forward(raw_vit_outputs, pixel_coords, kparams)
    out = jax.tree_util.tree_map(jax.block_until_ready, out)

    ref = reference_forward(raw_vit_outputs, pixel_coords, params)
    for name in ref:
        np.testing.assert_allclose(np.asarray(out[name]), np.asarray(ref[name]),
                                   rtol=2e-3, atol=2e-3)
    print("KERNEL_OK")
</pallas_src>

<mosaic_0001>
module attributes {stable_mosaic.version = 11 : i64} {
  func.func @_denoiser_kernel(%arg0: memref<128x128xf32, #tpu.memory_space<vmem>>, %arg1: memref<128x2xf32, #tpu.memory_space<vmem>>, %arg2: memref<136x128xf32, #tpu.memory_space<vmem>>, %arg3: memref<384x256xbf16, #tpu.memory_space<vmem>>, %arg4: memref<8xf32, #tpu.memory_space<smem>>) attributes {dimension_semantics = [], scalar_prefetch = 0 : i64, scratch_operands = 0 : i64, tpu.core_type = #tpu.core_type<tc>} {
    %c0 = arith.constant 0 : index
    %c0_0 = arith.constant 0 : index
    %0 = vector.load %arg0[%c0, %c0_0] : memref<128x128xf32, #tpu.memory_space<vmem>>, vector<128x128xf32>
    %c0_1 = arith.constant 0 : index
    %c0_2 = arith.constant 0 : index
    %1 = vector.load %arg1[%c0_1, %c0_2] : memref<128x2xf32, #tpu.memory_space<vmem>>, vector<128x2xf32>
    %c0_3 = arith.constant 0 : index
    %c0_4 = arith.constant 0 : index
    %2 = vector.load %arg2[%c0_3, %c0_4] : memref<136x128xf32, #tpu.memory_space<vmem>>, vector<128x128xf32>
    %c128 = arith.constant 128 : index
    %c0_5 = arith.constant 0 : index
    %3 = vector.load %arg2[%c128, %c0_5] : memref<136x128xf32, #tpu.memory_space<vmem>>, vector<8x128xf32>
    %4 = vector.extract_strided_slice %3 {offsets = [0, 0], sizes = [1, 128], strides = [1, 1]} : vector<8x128xf32> to vector<1x128xf32>
    %5 = vector.extract_strided_slice %3 {offsets = [1, 0], sizes = [1, 128], strides = [1, 1]} : vector<8x128xf32> to vector<1x128xf32>
    %6 = vector.extract_strided_slice %3 {offsets = [2, 0], sizes = [1, 128], strides = [1, 1]} : vector<8x128xf32> to vector<1x128xf32>
    %7 = vector.extract_strided_slice %3 {offsets = [3, 0], sizes = [1, 128], strides = [1, 1]} : vector<8x128xf32> to vector<1x128xf32>
    %8 = vector.extract_strided_slice %3 {offsets = [4, 0], sizes = [1, 128], strides = [1, 1]} : vector<8x128xf32> to vector<1x128xf32>
    %9 = vector.extract_strided_slice %3 {offsets = [5, 0], sizes = [1, 128], strides = [1, 1]} : vector<8x128xf32> to vector<1x128xf32>
    %10 = vector.extract_strided_slice %3 {offsets = [6, 0], sizes = [1, 128], strides = [1, 1]} : vector<8x128xf32> to vector<1x128xf32>
    %11 = vector.extract_strided_slice %1 {offsets = [0, 0], sizes = [128, 1], strides = [1, 1]} : vector<128x2xf32> to vector<128x1xf32>
    %12 = vector.broadcast %11 : vector<128x1xf32> to vector<128x128xf32>
    %13 = vector.broadcast %9 : vector<1x128xf32> to vector<128x128xf32>
    %14 = arith.mulf %12, %13 : vector<128x128xf32>
    %15 = vector.extract_strided_slice %1 {offsets = [0, 1], sizes = [128, 1], strides = [1, 1]} : vector<128x2xf32> to vector<128x1xf32>
    %16 = vector.broadcast %15 : vector<128x1xf32> to vector<128x128xf32>
    %17 = vector.broadcast %10 : vector<1x128xf32> to vector<128x128xf32>
    %18 = arith.mulf %16, %17 : vector<128x128xf32>
    %19 = arith.addf %14, %18 : vector<128x128xf32>
    %20 = vector.broadcast %4 : vector<1x128xf32> to vector<128x128xf32>
    %21 = arith.addf %19, %20 : vector<128x128xf32>
    %cst = arith.constant 0.000000e+00 : f32
    %22 = vector.broadcast %cst : f32 to vector<128x128xf32>
    %23 = arith.maximumf %21, %22 : vector<128x128xf32>
    %24 = arith.truncf %23 : vector<128x128xf32> to vector<128x128xbf16>
    %25 = arith.truncf %0 : vector<128x128xf32> to vector<128x128xbf16>
    %26 = tpu.concatenate %24, %25 in 1 : vector<128x128xbf16>, vector<128x128xbf16> -> vector<128x256xbf16>
    %c0_6 = arith.constant 0 : index
    %c0_7 = arith.constant 0 : index
    %27 = vector.load %arg3[%c0_6, %c0_7] : memref<384x256xbf16, #tpu.memory_space<vmem>>, vector<256x256xbf16>
    %cst_8 = arith.constant dense<0.000000e+00> : vector<128x256xf32>
    %28 = tpu.matmul %26, %27, %cst_8 {dimension_numbers = #tpu.dot_dimension_numbers<[1], [0], [0], [1], [0, 0, 1, 1], [], []>} : vector<128x256xbf16>, vector<256x256xbf16>, vector<128x256xf32> -> vector<128x256xf32>
    %29 = vector.extract_strided_slice %28 {offsets = [0, 0], sizes = [128, 128], strides = [1, 1]} : vector<128x256xf32> to vector<128x128xf32>
    %30 = vector.broadcast %5 : vector<1x128xf32> to vector<128x128xf32>
    %31 = arith.addf %29, %30 : vector<128x128xf32>
    %32 = vector.extract_strided_slice %28 {offsets = [0, 128], sizes = [128, 128], strides = [1, 1]} : vector<128x256xf32> to vector<128x128xf32>
    %33 = vector.broadcast %6 : vector<1x128xf32> to vector<128x128xf32>
    %34 = arith.addf %32, %33 : vector<128x128xf32>
    %cst_9 = arith.constant 0.000000e+00 : f32
    %35 = vector.broadcast %cst_9 : f32 to vector<128x128xf32>
    %36 = arith.maximumf %34, %35 : vector<128x128xf32>
    %c256 = arith.constant 256 : index
    %c0_10 = arith.constant 0 : index
    %37 = vector.load %arg3[%c256, %c0_10] : memref<384x256xbf16, #tpu.memory_space<vmem>>, vector<128x256xbf16>
    %38 = arith.truncf %36 : vector<128x128xf32> to vector<128x128xbf16>
    %39 = vector.extract_strided_slice %37 {offsets = [0, 0], sizes = [128, 128], strides = [1, 1]} : vector<128x256xbf16> to vector<128x128xbf16>
    %cst_11 = arith.constant dense<0.000000e+00> : vector<128x128xf32>
    %40 = tpu.matmul %38, %39, %cst_11 {dimension_numbers = #tpu.dot_dimension_numbers<[1], [0], [0], [1], [0, 0, 1, 1], [], []>} : vector<128x128xbf16>, vector<128x128xbf16>, vector<128x128xf32> -> vector<128x128xf32>
    %41 = vector.broadcast %7 : vector<1x128xf32> to vector<128x128xf32>
    %42 = arith.addf %40, %41 : vector<128x128xf32>
    %cst_12 = arith.constant 0.000000e+00 : f32
    %43 = vector.broadcast %cst_12 : f32 to vector<128x128xf32>
    %44 = arith.maximumf %42, %43 : vector<128x128xf32>
    %45 = arith.truncf %44 : vector<128x128xf32> to vector<128x128xbf16>
    %46 = vector.extract_strided_slice %37 {offsets = [0, 128], sizes = [128, 128], strides = [1, 1]} : vector<128x256xbf16> to vector<128x128xbf16>
    %cst_13 = arith.constant dense<0.000000e+00> : vector<128x128xf32>
    %47 = tpu.matmul %45, %46, %cst_13 {dimension_numbers = #tpu.dot_dimension_numbers<[1], [0], [0], [1], [0, 0, 1, 1], [], []>} : vector<128x128xbf16>, vector<128x128xbf16>, vector<128x128xf32> -> vector<128x128xf32>
    %48 = vector.broadcast %8 : vector<1x128xf32> to vector<128x128xf32>
    %49 = arith.addf %47, %48 : vector<128x128xf32>
    %50 = math.absf %49 : vector<128x128xf32>
    %51 = vector.shape_cast %50 : vector<128x128xf32> to vector<1x128x128xf32>
    %cst_14 = arith.constant dense<0.000000e+00> : vector<1xf32>
    %52 = vector.multi_reduction <add>, %51, %cst_14 [1, 2] : vector<1x128x128xf32> to vector<1xf32>
    %53 = vector.shape_cast %52 : vector<1xf32> to vector<1x1x1xf32>
    %54 = vector.extract %53[0, 0, 0] : f32 from vector<1x1x1xf32>
    %cst_15 = arith.constant 6.10351563E-5 : f32
    %55 = arith.mulf %54, %cst_15 : f32
    %cst_16 = arith.constant 2.000000e-02 : f32
    %56 = arith.mulf %cst_16, %55 : f32
    %57 = arith.addf %31, %2 : vector<128x128xf32>
    %58 = arith.addf %57, %49 : vector<128x128xf32>
    %59 = arith.subf %58, %0 : vector<128x128xf32>
    %60 = arith.mulf %59, %59 : vector<128x128xf32>
    %61 = vector.shape_cast %60 : vector<128x128xf32> to vector<1x128x128xf32>
    %cst_17 = arith.constant dense<0.000000e+00> : vector<1xf32>
    %62 = vector.multi_reduction <add>, %61, %cst_17 [1, 2] : vector<1x128x128xf32> to vector<1xf32>
    %63 = vector.shape_cast %62 : vector<1xf32> to vector<1x1x1xf32>
    %64 = vector.extract %63[0, 0, 0] : f32 from vector<1x1x1xf32>
    %cst_18 = arith.constant 6.10351563E-5 : f32
    %65 = arith.mulf %64, %cst_18 : f32
    %66 = arith.mulf %58, %0 : vector<128x128xf32>
    %cst_19 = arith.constant dense<0.000000e+00> : vector<128xf32>
    %67 = vector.multi_reduction <add>, %66, %cst_19 [1] : vector<128x128xf32> to vector<128xf32>
    %68 = vector.shape_cast %67 : vector<128xf32> to vector<128x1xf32>
    %69 = arith.mulf %58, %58 : vector<128x128xf32>
    %cst_20 = arith.constant dense<0.000000e+00> : vector<128xf32>
    %70 = vector.multi_reduction <add>, %69, %cst_20 [1] : vector<128x128xf32> to vector<128xf32>
    %71 = vector.shape_cast %70 : vector<128xf32> to vector<128x1xf32>
    %72 = arith.mulf %0, %0 : vector<128x128xf32>
    %cst_21 = arith.constant dense<0.000000e+00> : vector<128xf32>
    %73 = vector.multi_reduction <add>, %72, %cst_21 [1] : vector<128x128xf32> to vector<128xf32>
    %74 = vector.shape_cast %73 : vector<128xf32> to vector<128x1xf32>
    %75 = arith.mulf %71, %74 : vector<128x1xf32>
    %cst_22 = arith.constant 1.000000e-16 : f32
    %76 = vector.broadcast %cst_22 : f32 to vector<128x1xf32>
    %77 = arith.maximumf %75, %76 : vector<128x1xf32>
    %78 = math.rsqrt %77 : vector<128x1xf32>
    %79 = arith.mulf %68, %78 : vector<128x1xf32>
    %80 = vector.shape_cast %79 : vector<128x1xf32> to vector<1x128x1xf32>
    %cst_23 = arith.constant dense<0.000000e+00> : vector<1xf32>
    %81 = vector.multi_reduction <add>, %80, %cst_23 [1, 2] : vector<1x128x1xf32> to vector<1xf32>
    %82 = vector.shape_cast %81 : vector<1xf32> to vector<1x1x1xf32>
    %83 = vector.extract %82[0, 0, 0] : f32 from vector<1x1x1xf32>
    %cst_24 = arith.constant 7.812500e-03 : f32
    %84 = arith.mulf %83, %cst_24 : f32
    %cst_25 = arith.constant 1.000000e+00 : f32
    %85 = arith.subf %cst_25, %84 : f32
    %cst_26 = arith.constant 1.000000e-01 : f32
    %86 = arith.mulf %cst_26, %65 : f32
    %87 = arith.addf %65, %85 : f32
    %88 = arith.addf %87, %86 : f32
    %89 = arith.addf %88, %56 : f32
    %c0_27 = arith.constant 0 : index
    %90 = memref.load %arg4[%c0_27] : memref<8xf32, #tpu.memory_space<smem>>
    memref.store %65, %arg4[%c0_27] : memref<8xf32, #tpu.memory_space<smem>>
    %c1 = arith.constant 1 : index
    %91 = memref.load %arg4[%c1] : memref<8xf32, #tpu.memory_space<smem>>
    memref.store %85, %arg4[%c1] : memref<8xf32, #tpu.memory_space<smem>>
    %c2 = arith.constant 2 : index
    %92 = memref.load %arg4[%c2] : memref<8xf32, #tpu.memory_space<smem>>
    memref.store %86, %arg4[%c2] : memref<8xf32, #tpu.memory_space<smem>>
    %c3 = arith.constant 3 : index
    %93 = memref.load %arg4[%c3] : memref<8xf32, #tpu.memory_space<smem>>
    memref.store %56, %arg4[%c3] : memref<8xf32, #tpu.memory_space<smem>>
    %c4 = arith.constant 4 : index
    %94 = memref.load %arg4[%c4] : memref<8xf32, #tpu.memory_space<smem>>
    memref.store %89, %arg4[%c4] : memref<8xf32, #tpu.memory_space<smem>>
    %cst_28 = arith.constant 0.000000e+00 : f32
    %c5 = arith.constant 5 : index
    %95 = memref.load %arg4[%c5] : memref<8xf32, #tpu.memory_space<smem>>
    memref.store %cst_28, %arg4[%c5] : memref<8xf32, #tpu.memory_space<smem>>
    %cst_29 = arith.constant 0.000000e+00 : f32
    %c6 = arith.constant 6 : index
    %96 = memref.load %arg4[%c6] : memref<8xf32, #tpu.memory_space<smem>>
    memref.store %cst_29, %arg4[%c6] : memref<8xf32, #tpu.memory_space<smem>>
    %cst_30 = arith.constant 0.000000e+00 : f32
    %c7 = arith.constant 7 : index
    %97 = memref.load %arg4[%c7] : memref<8xf32, #tpu.memory_space<smem>>
    memref.store %cst_30, %arg4[%c7] : memref<8xf32, #tpu.memory_space<smem>>
    return
  }
}

</mosaic_0001>

<bundles_post_ra>
// kernel: tpu_custom_call.1
= control target key start
LH: loop header
LB: loop body
LE: loop exit
PB: predicated region body
PF: predicated region fallthrough
CT: control target
= control target key end

     0   :  { %9 = vsyncpa [#allocation3], 0  ;;  %s2333_s0 = inlined_call_operand.hbm [shape: f32[128,128], index: 0, kind: input, shape index: {}]   ;;  %s2334_s1 = inlined_call_operand.vmem [shape: f32[128,2], index: 1, kind: input, shape index: {}]   ;;  %s2335_s2 = inlined_call_operand.vmem [shape: f32[136,128], index: 2, kind: input, shape index: {}]   ;;  %s2336_s3 = inlined_call_operand.hbm [shape: bf16[384,256], index: 3, kind: input, shape index: {}]   ;;  %s2337_s4 = inlined_call_operand.hbm [shape: f32[8], index: 4, kind: output, shape index: {}]  }
   0x1   :  { %10 = vsyncpa [#allocation6], 0 }
   0x2   :  { %11 = vsyncpa [#allocation4], 0  ;;  %s1804_s15 = smov [#allocation2]   ;;  %s1744_s19 = scalar_lea.hbm %s2333_s0, 2048 }
   0x3   :  { %s17_s16 = sshll.u32 %s1804_s15, 4  ;;  %p1745_p0 = scmp.ne.s32.totalorder %s2333_s0, %s1744_s19  ;;  %s18_s16 = int_to_ptr.vmem [resolvable:$true] %s17_s16 }
   0x4   :  { %p1748_p1 = scmp.lt.u32.totalorder %s1744_s19, %s2333_s0 }
   0x6   :  { %p1750_p2 = pnand %p1748_p1, %p1745_p0 }
   0x8   :  { %1753 = shalt.err (!%p1750_p2)
}
   0x9   :  { %s1754_s24 = scalar_lea.vmem %s18_s16, 2048  ;;  %p1759_p4 = scmp.lt.s32.totalorder %s18_s16, %s18_s16 }
   0xa   :  { %p1755_p3 = scmp.ne.s32.totalorder %s18_s16, %s1754_s24  ;;  %p1760_p5 = scmp.lt.s32.totalorder %s1754_s24, %s1754_s24 }
   0xc   :  { %p1761_p6 = por %p1760_p5, %p1759_p4 }
   0xe   :  { %p1762_p7 = pnand %p1761_p6, %p1755_p3 }
  0x10   :  { %1765 = shalt.err (!%p1762_p7)
}
  0x11   :  { %s1805_s25 = smov 128   ;;  %s1806_s26 = smov 8  }
  0x12   :  { %23 = dma.hbm_to_vmem [thread:$0]  %s2333_s0, 2048, %s18_s16, [#allocation3], %s1805_s25, %s1805_s25, %s1806_s26  }
  0x13   :  { %s1807_s29 = smov [#allocation5]   ;;  %s1766_s7 = scalar_lea.hbm %s2336_s3, 6144 }
  0x14   :  { %s33_s30 = sshll.u32 %s1807_s29, 4  ;;  %p1767_p8 = scmp.ne.s32.totalorder %s2336_s3, %s1766_s7  ;;  %s34_s30 = int_to_ptr.vmem [resolvable:$true] %s33_s30 }
  0x15   :  { %p1770_p9 = scmp.lt.u32.totalorder %s1766_s7, %s2336_s3 }
  0x17   :  { %p1772_p10 = pnand %p1770_p9, %p1767_p8 }
  0x19   :  { %1775 = shalt.err (!%p1772_p10)
}
  0x1a   :  { %s1776_s12 = scalar_lea.vmem %s34_s30, 6144  ;;  %p1781_p12 = scmp.lt.s32.totalorder %s34_s30, %s34_s30 }
  0x1b   :  { %p1777_p11 = scmp.ne.s32.totalorder %s34_s30, %s1776_s12  ;;  %p1782_p13 = scmp.lt.s32.totalorder %s1776_s12, %s1776_s12 }
  0x1d   :  { %p1783_p0 = por %p1782_p13, %p1781_p12 }
  0x1f   :  { %p1784_p1 = pnand %p1783_p0, %p1777_p11 }
  0x21   :  { %1787 = shalt.err (!%p1784_p1)
}
  0x22   :  { %39 = dma.hbm_to_vmem [thread:$0]  %s2336_s3, 6144, %s34_s30, [#allocation6], %s1805_s25, %s1805_s25, %s1806_s26  }
  0x23   :  { %1798 = dma.done.wait [#allocation3], 2048  }
  0x24   :  { %1799 = vsyncadd [#allocation3], 4294965248 }
  0x25   :  { %1800 = dma.done.wait [#allocation6], 6144  }
  0x26   :  { %1801 = vsyncadd [#allocation6], 4294961152  ;;  %v1808_v0 = vmov 1   ;;  %v1809_v1 = vmov 0   ;;  %v63_v2 = vld [vmem:[%s2334_s1] sm:$0xff]  ;;  %v64_v3 = vld [vmem:[%s2334_s1 + $0x8] sm:$0xff]  ;;  %v176_v56 = vlaneseq }
  0x27   :  { %1615 = vset.pattern.permute.xlu1 %v1808_v0  ;;  %1614 = vset.pattern.permute.xlu0 %v1809_v1  ;;  %v1635_v4 = vld [vmem:[#allocation5 + $0x4] ss:$8 sps:$4 sm:$0xff]   ;;  %v65_v5 = vld [vmem:[%s2334_s1 + $0x10] sm:$0xff]  ;;  %v1637_v6 = vld [vmem:[#allocation5] ss:$8 sps:$4 sm:$0xff]   ;;  %vm1378_vm0 = vcmask 7168  }
  0x28   :  { %197 = vperm.xlu1 %1615, %v63_v2   ;;  %98 = vperm.xlu0 %1614, %v63_v2   ;;  %v66_v7 = vld [vmem:[%s2334_s1 + $0x18] sm:$0xff]  ;;  %v1641_v10 = vld [vmem:[#allocation5 + $0x24] ss:$8 sps:$4 sm:$0xff]   ;;  %v1643_v11 = vld [vmem:[#allocation5 + $0x20] ss:$8 sps:$4 sm:$0xff]   ;;  %v1936_v57 = vshrl.u32 %v176_v56, 7 }
  0x29   :  { %540 = vmatprep.subr.bf16.mxu0 %v1635_v4  ;;  %v1638_v8 = vld [vmem:[#allocation5 + $0x14] ss:$8 sps:$4 sm:$0xff]   ;;  %v1640_v9 = vld [vmem:[#allocation5 + $0x10] ss:$8 sps:$4 sm:$0xff]   ;;  %v67_v13 = vld [vmem:[%s2334_s1 + $0x20] sm:$0xff]  ;;  %s1810_s26 = smov 0.0  }
  0x2a   :  { %541 = vmatpush1.bf16.msra.mxu0 %v1637_v6  ;;  %v1644_v12 = vld [vmem:[#allocation5 + $0x34] ss:$8 sps:$4 sm:$0xff]   ;;  %v1646_v15 = vld [vmem:[#allocation5 + $0x30] ss:$8 sps:$4 sm:$0xff]   ;;  %v1647_v16 = vld [vmem:[#allocation5 + $0x44] ss:$8 sps:$4 sm:$0xff]  }
  0x2b   :  { %542 = vmatprep.subr.bf16.mxu0 %v1638_v8  ;;  %v69_v14 = vld [vmem:[%s2334_s1 + $0x30] sm:$0xff]  ;;  %v68_v17 = vld [vmem:[%s2334_s1 + $0x28] sm:$0xff]  ;;  %v1893_v24 = vld [vmem:[#allocation2] sm:$0xff]  ;;  %v262_v58 = vsub.s32 6, %v1936_v57  ;;  %v178_v59 = vsub.s32 5, %v1936_v57  ;;  %v298_v63 = vsub.s32 0, %v1936_v57 }
  0x2c   :  { %201 = vperm.xlu1 %1615, %v64_v3   ;;  %103 = vperm.xlu0 %1614, %v64_v3   ;;  %v1649_v18 = vld [vmem:[#allocation5 + $0x40] ss:$8 sps:$4 sm:$0xff]   ;;  %v1650_v19 = vld [vmem:[#allocation5 + $0x54] ss:$8 sps:$4 sm:$0xff]   ;;  %v1652_v20 = vld [vmem:[#allocation5 + $0x50] ss:$8 sps:$4 sm:$0xff]  }
  0x2d   :  { %v1653_v21 = vld [vmem:[#allocation5 + $0x64] ss:$8 sps:$4 sm:$0xff]   ;;  %v1655_v23 = vld [vmem:[#allocation5 + $0x60] ss:$8 sps:$4 sm:$0xff]   ;;  %v1656_v26 = vld [vmem:[#allocation5 + $0x74] ss:$8 sps:$4 sm:$0xff]  }
  0x2e   :  { %543 = vmatpush1.bf16.msra.mxu0 %v1640_v9  ;;  %v72_v22 = vld [vmem:[%s2334_s1 + $0x48] sm:$0xff]  ;;  %v70_v28 = vld [vmem:[%s2334_s1 + $0x38] sm:$0xff]  ;;  %v73_v30 = vld [vmem:[%s2334_s1 + $0x50] sm:$0xff]  ;;  %1436 = sst [smem:[#allocation7 + $0x5]] %s1810_s26  ;;  %s1788_s9 = scalar_lea.hbm %s2337_s4, 16 }
  0x2f   :  { %544 = vmatprep.subr.bf16.mxu0 %v1641_v10  ;;  %v1895_v25 = vld [vmem:[#allocation2 + $0x8] sm:$0xff]  ;;  %v1658_v29 = vld [vmem:[#allocation5 + $0x70] ss:$8 sps:$4 sm:$0xff]   ;;  %v1662_v33 = vld [vmem:[#allocation5 + $0x94] ss:$8 sps:$4 sm:$0xff]   ;;  %1438 = sst [smem:[#allocation7 + $0x6]] %s1810_s26  ;;  %p1789_p2 = scmp.ne.s32.totalorder %s2337_s4, %s1788_s9 }
  0x30   :  { %1616 = vset.pattern.permute.xlu1 %v1809_v1  ;;  %108 = vperm.xlu0 %1614, %v65_v5   ;;  %v340_v27 = vpack.c.bf16 %v1895_v25, %v1893_v24  ;;  %v1659_v31 = vld [vmem:[#allocation5 + $0x84] ss:$8 sps:$4 sm:$0xff]   ;;  %v1661_v32 = vld [vmem:[#allocation5 + $0x80] ss:$8 sps:$4 sm:$0xff]   ;;  %v1664_v34 = vld [vmem:[#allocation5 + $0x90] ss:$8 sps:$4 sm:$0xff]   ;;  %p1792_p3 = scmp.lt.u32.totalorder %s1788_s9, %s2337_s4 }
  0x31   :  { %113 = vperm.xlu1 %1616, %v66_v7   ;;  %v71_v35 = vld [vmem:[%s2334_s1 + $0x40] sm:$0xff]  ;;  %v76_v37 = vld [vmem:[%s2334_s1 + $0x68] sm:$0xff]  ;;  %v77_v39 = vld [vmem:[%s2334_s1 + $0x70] sm:$0xff]  ;;  %1440 = sst [smem:[#allocation7 + $0x7]] %s1810_s26 }
  0x32   :  { %545 = vmatpush1.bf16.msra.mxu0 %v1643_v11  ;;  %572 = vmatprep.mubr.bf16.mxu0 %v340_v27  ;;  %v1665_v36 = vld [vmem:[#allocation5 + $0xa4] ss:$8 sps:$4 sm:$0xff]   ;;  %v1667_v38 = vld [vmem:[#allocation5 + $0xa0] ss:$8 sps:$4 sm:$0xff]   ;;  %v1668_v40 = vld [vmem:[#allocation5 + $0xb4] ss:$8 sps:$4 sm:$0xff]   ;;  %p1794_p4 = pnand %p1792_p3, %p1789_p2 }
  0x33   :  { %546 = vmatprep.subr.bf16.mxu0 %v1644_v12  ;;  %v1670_v41 = vld [vmem:[#allocation5 + $0xb0] ss:$8 sps:$4 sm:$0xff]   ;;  %v1671_v42 = vld [vmem:[#allocation5 + $0xc4] ss:$8 sps:$4 sm:$0xff]   ;;  %v1673_v43 = vld [vmem:[#allocation5 + $0xc0] ss:$8 sps:$4 sm:$0xff]  }
  0x34   :  { %1617 = vset.pattern.permute.xlu0 %v1808_v0  ;;  %v1674_v44 = vld [vmem:[#allocation5 + $0xd4] ss:$8 sps:$4 sm:$0xff]   ;;  %v1676_v46 = vld [vmem:[#allocation5 + $0xd0] ss:$8 sps:$4 sm:$0xff]   ;;  %v1677_v47 = vld [vmem:[#allocation5 + $0xe4] ss:$8 sps:$4 sm:$0xff]  }
  0x35   :  { %1618 = vset.pattern.permute.xlu1 %v1808_v0  ;;  %205 = vperm.xlu0 %1617, %v65_v5   ;;  %v74_v45 = vld [vmem:[%s2334_s1 + $0x58] sm:$0xff]  ;;  %v1679_v48 = vld [vmem:[#allocation5 + $0xe0] ss:$8 sps:$4 sm:$0xff]   ;;  %v1987_v56 = vld [vmem:[#allocation2 + $0x30] sm:$0xff] }
  0x36   :  { %209 = vperm.xlu1 %1618, %v66_v7   ;;  %547 = vmatpush1.bf16.msra.mxu0 %v1646_v15  ;;  %v1680_v49 = vld [vmem:[#allocation5 + $0xf4] ss:$8 sps:$4 sm:$0xff]   ;;  %v1682_v50 = vld [vmem:[#allocation5 + $0xf0] ss:$8 sps:$4 sm:$0xff]   ;;  %v75_v51 = vld [vmem:[%s2334_s1 + $0x60] sm:$0xff] }
  0x37   :  { %548 = vmatprep.subr.bf16.mxu0 %v1647_v16  ;;  %v78_v52 = vld [vmem:[%s2334_s1 + $0x78] sm:$0xff]  ;;  %v1683_v53 = vld [vmem:[#allocation5 + $0x100] ss:$8 sps:$4 sm:$0xff]   ;;  %v1961_v15 = vld [vmem:[#allocation2 + $0x10] sm:$0xff] }
  0x38   :  { %v1686_v54 = vld [vmem:[#allocation5 + $0x110] ss:$8 sps:$4 sm:$0xff]   ;;  %1536 = vmatprep.subr.bf16.mxu1 %v1683_v53  ;;  %v1688_v55 = vld [vmem:[#allocation5 + $0x120] ss:$8 sps:$4 sm:$0xff]  }
  0x39   :  { %221 = vperm.xlu0 %1617, %v69_v14   ;;  %1537 = vmatpush3.bf16.msra.mxu1 %v1683_v53  ;;  %v1943_v60 = vld [vmem:[%s2335_s2 + $0x80] sm:$0xff]  ;;  %v1963_v16 = vld [vmem:[#allocation2 + $0x18] sm:$0xff] }
  0x3a   :  { %1619 = vset.pattern.permute.xlu1 %v1809_v1  ;;  %549 = vmatpush1.bf16.msra.mxu0 %v1649_v18  ;;  %v1946_v61 = vrot.slane %v1943_v60, %v262_v58  ;;  %v1949_v62 = vrot.slane %v1943_v60, %v178_v59  ;;  %v1955_v4 = vrot.slane %v1943_v60, %v298_v63  ;;  %v1989_v58 = vld [vmem:[#allocation2 + $0x38] sm:$0xff] }
  0x3b   :  { %118 = vperm.xlu1 %1619, %v67_v13   ;;  %550 = vmatprep.subr.bf16.mxu0 %v1650_v19 }
  0x3c   :  { %1538 = vmatprep.subr.bf16.mxu1 %v1686_v54 }
  0x3d   :  { %1622 = vset.pattern.permute.xlu0 %v1809_v1  ;;  %1539 = vmatpush3.bf16.msra.mxu1 %v1686_v54 }
  0x3e   :  { %123 = vperm.xlu0 %1622, %v68_v17   ;;  %551 = vmatpush1.bf16.msra.mxu0 %v1652_v20  ;;  %v341_v20 = vpack.c.bf16 %v1963_v16, %v1961_v15 }
  0x3f   :  { %1620 = vset.pattern.permute.xlu1 %v1808_v0  ;;  %552 = vmatprep.subr.bf16.mxu0 %v1653_v21 }
  0x40   :  { %213 = vperm.xlu1 %1620, %v67_v13   ;;  %1540 = vmatprep.subr.bf16.mxu1 %v1688_v55 }
  0x41   :  { %1541 = vmatpush3.bf16.msra.mxu1 %v1688_v55 }
  0x42   :  { %128 = vperm.xlu0 %1622, %v69_v14   ;;  %553 = vmatpush1.bf16.msra.mxu0 %v1655_v23 }
  0x43   :  { %554 = vmatprep.subr.bf16.mxu0 %v1656_v26 }
  0x44   :  { %217 = vperm.xlu1 %1620, %v68_v17  }
  0x46   :  { %143 = vperm.xlu0 %1622, %v72_v22   ;;  %555 = vmatpush1.bf16.msra.mxu0 %v1658_v29 }
  0x47   :  { %556 = vmatprep.subr.bf16.mxu0 %v1659_v31 }
  0x48   :  { %1621 = vset.pattern.permute.xlu1 %v1809_v1 }
  0x49   :  { %133 = vperm.xlu1 %1621, %v70_v28  }
  0x4a   :  { %1627 = vset.pattern.permute.xlu0 %v1808_v0  ;;  %557 = vmatpush1.bf16.msra.mxu0 %v1661_v32 }
  0x4b   :  { %237 = vperm.xlu0 %1627, %v73_v30   ;;  %558 = vmatprep.subr.bf16.mxu0 %v1662_v33 }
  0x4d   :  { %1623 = vset.pattern.permute.xlu1 %v1808_v0 }
  0x4e   :  { %225 = vperm.xlu1 %1623, %v70_v28   ;;  %559 = vmatpush1.bf16.msra.mxu0 %v1664_v34 }
  0x4f   :  { %1628 = vset.pattern.permute.xlu0 %v1809_v1  ;;  %560 = vmatprep.subr.bf16.mxu0 %v1665_v36  ;;  %v1975_v36 = vld [vmem:[#allocation2 + $0x28] sm:$0xff] }
  0x50   :  { %148 = vperm.xlu0 %1628, %v73_v30  }
  0x52   :  { %1624 = vset.pattern.permute.xlu1 %v1809_v1  ;;  %561 = vmatpush1.bf16.msra.mxu0 %v1667_v38 }
  0x53   :  { %138 = vperm.xlu1 %1624, %v71_v35   ;;  %562 = vmatprep.subr.bf16.mxu0 %v1668_v40 }
  0x54   :  { %163 = vperm.xlu0 %1628, %v76_v37  }
  0x56   :  { %563 = vmatpush1.bf16.msra.mxu0 %v1670_v41 }
  0x57   :  { %1625 = vset.pattern.permute.xlu1 %v1808_v0  ;;  %564 = vmatprep.subr.bf16.mxu0 %v1671_v42 }
  0x58   :  { %229 = vperm.xlu1 %1625, %v71_v35   ;;  %168 = vperm.xlu0 %1628, %v77_v39   ;;  %v1973_v35 = vld [vmem:[#allocation2 + $0x20] sm:$0xff] }
  0x5a   :  { %565 = vmatpush1.bf16.msra.mxu0 %v1673_v43 }
  0x5b   :  { %566 = vmatprep.subr.bf16.mxu0 %v1674_v44 }
  0x5c   :  { %233 = vperm.xlu1 %1625, %v72_v22   ;;  %1633 = vset.pattern.permute.xlu0 %v1808_v0 }
  0x5d   :  { %253 = vperm.xlu0 %1633, %v77_v39   ;;  %v342_v39 = vpack.c.bf16 %v1975_v36, %v1973_v35 }
  0x5e   :  { %567 = vmatpush1.bf16.msra.mxu0 %v1676_v46 }
  0x5f   :  { %568 = vmatprep.subr.bf16.mxu0 %v1677_v47 }
  0x60   :  { %1626 = vset.pattern.permute.xlu1 %v1809_v1 }
  0x61   :  { %153 = vperm.xlu1 %1626, %v74_v45  }
  0x62   :  { %569 = vmatpush1.bf16.msra.mxu0 %v1679_v48 }
  0x63   :  { %570 = vmatprep.subr.bf16.mxu0 %v1680_v49 }
  0x65   :  { %1629 = vset.pattern.permute.xlu1 %v1808_v0 }
  0x66   :  { %241 = vperm.xlu1 %1629, %v74_v45   ;;  %571 = vmatpush1.bf16.msra.mxu0 %v1682_v50 }
  0x6a   :  { %1630 = vset.pattern.permute.xlu1 %v1809_v1 }
  0x6b   :  { %158 = vperm.xlu1 %1630, %v75_v51  }
  0x6f   :  { %1631 = vset.pattern.permute.xlu1 %v1808_v0 }
  0x70   :  { %245 = vperm.xlu1 %1631, %v75_v51  }
  0x74   :  { %249 = vperm.xlu1 %1631, %v76_v37  }
  0x78   :  { %1632 = vset.pattern.permute.xlu1 %v1809_v1 }
  0x79   :  { %173 = vperm.xlu1 %1632, %v78_v52  }
  0x7d   :  { %1634 = vset.pattern.permute.xlu1 %v1808_v0 }
  0x7e   :  { %257 = vperm.xlu1 %1634, %v78_v52  }
  0xa7   :  { %v198_v0 = vpop.permute.xlu1 %197  ;;  %v99_v1 = vpop.permute.xlu0 %98 }
  0xa8   :  { %v264_v2 = vmul.f32 %v1946_v61, %v198_v0  ;;  %v180_v3 = vmul.f32 %v1949_v62, %v99_v1  ;;  %v343_v0 = vpack.c.bf16 %v1989_v58, %v1987_v56 }
  0xaa   :  { %v280_v5 = vadd.f32 %v264_v2, %v180_v3 }
  0xab   :  { %v202_v6 = vpop.permute.xlu1 %201  ;;  %v104_v7 = vpop.permute.xlu0 %103 }
  0xac   :  { %v265_v8 = vmul.f32 %v1946_v61, %v202_v6  ;;  %v181_v9 = vmul.f32 %v1949_v62, %v104_v7  ;;  %v300_v10 = vadd.f32 %v1955_v4, %v280_v5 }
  0xae   :  { %v281_v11 = vadd.f32 %v265_v8, %v181_v9  ;;  %v316_v17 = vmax.f32 %v300_v10, 0.0 }
  0xaf   :  { %v109_v12 = vpop.permute.xlu0 %108 }
  0xb0   :  { %v301_v13 = vadd.f32 %v1955_v4, %v281_v11  ;;  %v114_v14 = vpop.permute.xlu1 %113  ;;  %v182_v19 = vmul.f32 %v1949_v62, %v109_v12  ;;  %v1997_v11 = vld [vmem:[#allocation2 + $0x40] sm:$0xff]  ;;  %v1999_v12 = vld [vmem:[#allocation2 + $0x48] sm:$0xff] }
  0xb1   :  { %v183_v27 = vmul.f32 %v1949_v62, %v114_v14 }
  0xb2   :  { %v317_v18 = vmax.f32 %v301_v13, 0.0 }
  0xb4   :  { %v206_v21 = vpop.permute.xlu0 %205  ;;  %v332_v22 = vpack.c.bf16 %v317_v18, %v316_v17  ;;  %v344_v18 = vpack.c.bf16 %v1999_v12, %v1997_v11 }
  0xb5   :  { %v210_v23 = vpop.permute.xlu1 %209  ;;  %v266_v26 = vmul.f32 %v1946_v61, %v206_v21 }
  0xb6   :  { %v267_v28 = vmul.f32 %v1946_v61, %v210_v23  ;;  %573 = vmatmul.mubr.bf16.vlgmr.msra.gmra.mrb[0].mxu0 %v332_v22 }
  0xb7   :  { %v282_v29 = vadd.f32 %v266_v26, %v182_v19  ;;  %582 = vmatprep.mubr.bf16.mxu0 %v341_v20 }
  0xb8   :  { %v283_v30 = vadd.f32 %v267_v28, %v183_v27  ;;  %v222_v32 = vpop.permute.xlu0 %221 }
  0xb9   :  { %v302_v31 = vadd.f32 %v1955_v4, %v282_v29  ;;  %v270_v52 = vmul.f32 %v1946_v61, %v222_v32 }
  0xba   :  { %v303_v33 = vadd.f32 %v1955_v4, %v283_v30  ;;  %v119_v34 = vpop.permute.xlu1 %118 }
  0xbb   :  { %v318_v37 = vmax.f32 %v302_v31, 0.0  ;;  %v184_v43 = vmul.f32 %v1949_v62, %v119_v34 }
  0xbc   :  { %v319_v38 = vmax.f32 %v303_v33, 0.0 }
  0xbd   :  { %v124_v42 = vpop.permute.xlu0 %123 }
  0xbe   :  { %v333_v40 = vpack.c.bf16 %v319_v38, %v318_v37  ;;  %v185_v46 = vmul.f32 %v1949_v62, %v124_v42 }
  0xbf   :  { %v214_v41 = vpop.permute.xlu1 %213 }
  0xc0   :  { %v268_v44 = vmul.f32 %v1946_v61, %v214_v41  ;;  %583 = vmatmul.mubr.bf16.gmra.mrb[4].mxu0 %v333_v40  ;;  %v2013_v40 = vld [vmem:[#allocation2 + $0x58] sm:$0xff] }
  0xc1   :  { %592 = vmatprep.mubr.bf16.mxu0 %v342_v39  ;;  %v129_v49 = vpop.permute.xlu0 %128  ;;  %v2011_v39 = vld [vmem:[#allocation2 + $0x50] sm:$0xff] }
  0xc2   :  { %v284_v45 = vadd.f32 %v268_v44, %v184_v43  ;;  %v186_v54 = vmul.f32 %v1949_v62, %v129_v49  ;;  %v345_v44 = vpack.c.bf16 %v2013_v40, %v2011_v39 }
  0xc3   :  { %v218_v47 = vpop.permute.xlu1 %217 }
  0xc4   :  { %v269_v48 = vmul.f32 %v1946_v61, %v218_v47  ;;  %v304_v50 = vadd.f32 %v1955_v4, %v284_v45  ;;  %v286_v1 = vadd.f32 %v270_v52, %v186_v54 }
  0xc5   :  { %v144_v13 = vpop.permute.xlu0 %143 }
  0xc6   :  { %v285_v51 = vadd.f32 %v269_v48, %v185_v46  ;;  %v320_v59 = vmax.f32 %v304_v50, 0.0  ;;  %v306_v7 = vadd.f32 %v1955_v4, %v286_v1  ;;  %v189_v28 = vmul.f32 %v1949_v62, %v144_v13 }
  0xc8   :  { %v305_v53 = vadd.f32 %v1955_v4, %v285_v51  ;;  %v134_v55 = vpop.permute.xlu1 %133  ;;  %v322_v14 = vmax.f32 %v306_v7, 0.0 }
  0xc9   :  { %v187_v5 = vmul.f32 %v1949_v62, %v134_v55  ;;  %v2021_v55 = vld [vmem:[#allocation2 + $0x60] sm:$0xff] }
  0xca   :  { %v321_v63 = vmax.f32 %v305_v53, 0.0  ;;  %v238_v21 = vpop.permute.xlu0 %237 }
  0xcb   :  { %v274_v33 = vmul.f32 %v1946_v61, %v238_v21 }
  0xcc   :  { %v334_v2 = vpack.c.bf16 %v321_v63, %v320_v59  ;;  %v2023_v59 = vld [vmem:[#allocation2 + $0x68] sm:$0xff] }
  0xcd   :  { %v226_v3 = vpop.permute.xlu1 %225 }
  0xce   :  { %v271_v6 = vmul.f32 %v1946_v61, %v226_v3  ;;  %593 = vmatmul.mubr.bf16.gmra.mrb[8].mxu0 %v334_v2 }
  0xcf   :  { %602 = vmatprep.mubr.bf16.mxu0 %v343_v0  ;;  %v149_v30 = vpop.permute.xlu0 %148  ;;  %v346_v0 = vpack.c.bf16 %v2023_v59, %v2021_v55 }
  0xd0   :  { %v287_v8 = vadd.f32 %v271_v6, %v187_v5  ;;  %v190_v34 = vmul.f32 %v1949_v62, %v149_v30 }
  0xd2   :  { %v307_v9 = vadd.f32 %v1955_v4, %v287_v8  ;;  %v139_v10 = vpop.permute.xlu1 %138  ;;  %v290_v43 = vadd.f32 %v274_v33, %v190_v34 }
  0xd3   :  { %v188_v22 = vmul.f32 %v1949_v62, %v139_v10  ;;  %v164_v51 = vpop.permute.xlu0 %163 }
  0xd4   :  { %v323_v17 = vmax.f32 %v307_v9, 0.0  ;;  %v310_v48 = vadd.f32 %v1955_v4, %v290_v43  ;;  %v193_v9 = vmul.f32 %v1949_v62, %v164_v51 }
  0xd6   :  { %v335_v19 = vpack.c.bf16 %v323_v17, %v322_v14  ;;  %v326_v52 = vmax.f32 %v310_v48, 0.0 }
  0xd7   :  { %v230_v20 = vpop.permute.xlu1 %229  ;;  %v169_v2 = vpop.permute.xlu0 %168 }
  0xd8   :  { %v272_v23 = vmul.f32 %v1946_v61, %v230_v20  ;;  %603 = vmatmul.mubr.bf16.gmra.mrb[12].mxu0 %v335_v19 }
  0xd9   :  { %612 = vmatprep.mubr.bf16.mxu0 %v344_v18  ;;  %v194_v18 = vmul.f32 %v1949_v62, %v169_v2 }
  0xda   :  { %v288_v26 = vadd.f32 %v272_v23, %v188_v22  ;;  %v2035_v22 = vld [vmem:[#allocation2 + $0x70] sm:$0xff]  ;;  %v2037_v23 = vld [vmem:[#allocation2 + $0x78] sm:$0xff] }
  0xdb   :  { %v234_v27 = vpop.permute.xlu1 %233 }
  0xdc   :  { %v273_v29 = vmul.f32 %v1946_v61, %v234_v27  ;;  %v308_v31 = vadd.f32 %v1955_v4, %v288_v26  ;;  %v254_v13 = vpop.permute.xlu0 %253 }
  0xdd   :  { %v278_v19 = vmul.f32 %v1946_v61, %v254_v13 }
  0xde   :  { %v289_v32 = vadd.f32 %v273_v29, %v189_v28  ;;  %v324_v41 = vmax.f32 %v308_v31, 0.0  ;;  %v347_v28 = vpack.c.bf16 %v2037_v23, %v2035_v22 }
  0xdf   :  { %v294_v29 = vadd.f32 %v278_v19, %v194_v18 }
  0xe0   :  { %v309_v37 = vadd.f32 %v1955_v4, %v289_v32  ;;  %v154_v38 = vpop.permute.xlu1 %153 }
  0xe1   :  { %v191_v47 = vmul.f32 %v1949_v62, %v154_v38  ;;  %v314_v34 = vadd.f32 %v1955_v4, %v294_v29 }
  0xe2   :  { %v325_v42 = vmax.f32 %v309_v37, 0.0 }
  0xe4   :  { %v336_v45 = vpack.c.bf16 %v325_v42, %v324_v41  ;;  %v330_v41 = vmax.f32 %v314_v34, 0.0  ;;  %v1704_v34 = vld [vmem:[#allocation5 + $0x154] ss:$8 sps:$4 sm:$0xff]  }
  0xe5   :  { %v242_v46 = vpop.permute.xlu1 %241 }
  0xe6   :  { %v275_v49 = vmul.f32 %v1946_v61, %v242_v46  ;;  %613 = vmatmul.mubr.bf16.gmra.mrb[16].mxu0 %v336_v45  ;;  %v1692_v45 = vld [vmem:[#allocation5 + $0x140] ss:$8 sps:$4 sm:$0xff]   ;;  %v1685_v46 = vld [vmem:[#allocation5 + $0x104] ss:$8 sps:$4 sm:$0xff]  }
  0xe7   :  { %622 = vmatprep.mubr.bf16.mxu0 %v345_v44  ;;  %v1690_v44 = vld [vmem:[#allocation5 + $0x130] ss:$8 sps:$4 sm:$0xff]  }
  0xe8   :  { %v291_v50 = vadd.f32 %v275_v49, %v191_v47  ;;  %1542 = vmatprep.subr.bf16.mxu1 %v1690_v44  ;;  %v1698_v47 = vld [vmem:[#allocation5 + $0x170] ss:$8 sps:$4 sm:$0xff]  }
  0xe9   :  { %1543 = vmatpush3.bf16.msra.mxu1 %v1690_v44 }
  0xea   :  { %v311_v53 = vadd.f32 %v1955_v4, %v291_v50  ;;  %v159_v54 = vpop.permute.xlu1 %158  ;;  %1544 = vmatprep.subr.bf16.mxu1 %v1692_v45 }
  0xeb   :  { %v192_v5 = vmul.f32 %v1949_v62, %v159_v54 }
  0xec   :  { %v327_v63 = vmax.f32 %v311_v53, 0.0 }
  0xed   :  { %1545 = vmatpush3.bf16.msra.mxu1 %v1692_v45 }
  0xee   :  { %v337_v1 = vpack.c.bf16 %v327_v63, %v326_v52 }
  0xef   :  { %v246_v3 = vpop.permute.xlu1 %245 }
  0xf0   :  { %v276_v6 = vmul.f32 %v1946_v61, %v246_v3  ;;  %623 = vmatmul.mubr.bf16.gmra.mrb[20].mxu0 %v337_v1 }
  0xf1   :  { %632 = vmatprep.mubr.bf16.mxu0 %v346_v0 }
  0xf2   :  { %v292_v7 = vadd.f32 %v276_v6, %v192_v5 }
  0xf3   :  { %v250_v8 = vpop.permute.xlu1 %249 }
  0xf4   :  { %v277_v10 = vmul.f32 %v1946_v61, %v250_v8  ;;  %v312_v14 = vadd.f32 %v1955_v4, %v292_v7 }
  0xf6   :  { %v293_v17 = vadd.f32 %v277_v10, %v193_v9  ;;  %v328_v26 = vmax.f32 %v312_v14, 0.0  ;;  %v1700_v14 = vld [vmem:[#allocation5 + $0x114] ss:$8 sps:$4 sm:$0xff]  }
  0xf8   :  { %v313_v20 = vadd.f32 %v1955_v4, %v293_v17  ;;  %v174_v21 = vpop.permute.xlu1 %173  ;;  %v1701_v17 = vld [vmem:[#allocation5 + $0x124] ss:$8 sps:$4 sm:$0xff]  }
  0xf9   :  { %v195_v32 = vmul.f32 %v1949_v62, %v174_v21  ;;  %v1694_v62 = vld [vmem:[#allocation5 + $0x150] ss:$8 sps:$4 sm:$0xff]  }
  0xfa   :  { %v329_v27 = vmax.f32 %v313_v20, 0.0  ;;  %1546 = vmatprep.subr.bf16.mxu1 %v1694_v62 }
  0xfb   :  { %1547 = vmatpush3.bf16.msra.mxu1 %v1694_v62 }
  0xfc   :  { %v338_v30 = vpack.c.bf16 %v329_v27, %v328_v26  ;;  %v1702_v26 = vld [vmem:[#allocation5 + $0x134] ss:$8 sps:$4 sm:$0xff]  }
  0xfd   :  { %v258_v31 = vpop.permute.xlu1 %257 }
  0xfe   :  { %v279_v33 = vmul.f32 %v1946_v61, %v258_v31  ;;  %633 = vmatmul.mubr.bf16.gmra.mrb[24].mxu0 %v338_v30  ;;  %v1696_v61 = vld [vmem:[#allocation5 + $0x160] ss:$8 sps:$4 sm:$0xff]   ;;  %v1703_v31 = vld [vmem:[#allocation5 + $0x144] ss:$8 sps:$4 sm:$0xff]  }
  0xff   :  { %642 = vmatprep.mubr.bf16.mxu0 %v347_v28  ;;  %1548 = vmatprep.subr.bf16.mxu1 %v1696_v61 }
 0x100   :  { %v295_v37 = vadd.f32 %v279_v33, %v195_v32  ;;  %1549 = vmatpush3.bf16.msra.mxu1 %v1696_v61 }
 0x101   :  { %1550 = vmatprep.subr.bf16.mxu1 %v1698_v47 }
 0x102   :  { %v315_v38 = vadd.f32 %v1955_v4, %v295_v37  ;;  %v675_v4 = vsub.s32 2, %v1936_v57 }
 0x104   :  { %v331_v42 = vmax.f32 %v315_v38, 0.0  ;;  %1551 = vmatpush3.bf16.msra.mxu1 %v1698_v47  ;;  %v2047_v48 = vrot.slane %v1943_v60, %v675_v4 }
 0x105   :  { %1568 = vmatprep.subr.bf16.mxu1 %v1685_v46 }
 0x106   :  { %v339_v43 = vpack.c.bf16 %v331_v42, %v330_v41 }
 0x108   :  { %643 = vmatmul.mubr.bf16.gmra.mrb[28].mxu0 %v339_v43 }
 0x189   :  { %v2049_v49 = vpop.f32.mrb[0].mxu0 }
 0x18a   :  { %v576_v50 = vpop.f32.mrb[1].mxu0 }
 0x18b   :  { %v677_v51 = vadd.f32 %v2047_v48, %v576_v50  ;;  %v2052_v52 = vpop.f32.mrb[2].mxu0 }
 0x18c   :  { %v580_v53 = vpop.f32.mrb[3].mxu0 }
 0x18d   :  { %v678_v54 = vadd.f32 %v2047_v48, %v580_v53  ;;  %v693_v63 = vmax.f32 %v677_v51, 0.0 }
 0x18f   :  { %v694_v0 = vmax.f32 %v678_v54, 0.0 }
 0x191   :  { %v725_v1 = vpack.c.bf16 %v694_v0, %v693_v63 }
 0x193   :  { %v2055_v2 = vpop.f32.mrb[4].mxu0  ;;  %1552 = vmatprep.mubr.bf16.mxu1 %v725_v1 }
 0x194   :  { %v586_v3 = vpop.f32.mrb[5].mxu0 }
 0x195   :  { %v679_v5 = vadd.f32 %v2047_v48, %v586_v3  ;;  %v2058_v6 = vpop.f32.mrb[6].mxu0 }
 0x196   :  { %v590_v7 = vpop.f32.mrb[7].mxu0 }
 0x197   :  { %v680_v8 = vadd.f32 %v2047_v48, %v590_v7  ;;  %v695_v9 = vmax.f32 %v679_v5, 0.0 }
 0x199   :  { %v696_v10 = vmax.f32 %v680_v8, 0.0 }
 0x19b   :  { %v726_v13 = vpack.c.bf16 %v696_v10, %v695_v9 }
 0x19d   :  { %1553 = vmatmul.mubr.bf16.vlgmr.msra.gmra.mrb[0].mxu1 %v726_v13 }
 0x19e   :  { %1569 = vmatpush3.bf16.msra.mxu1 %v1685_v46 }
 0x19f   :  { %1570 = vmatprep.subr.bf16.mxu1 %v1700_v14 }
 0x1a1   :  { %v2061_v18 = vpop.f32.mrb[8].mxu0 }
 0x1a2   :  { %v596_v19 = vpop.f32.mrb[9].mxu0  ;;  %1571 = vmatpush3.bf16.msra.mxu1 %v1700_v14 }
 0x1a3   :  { %v681_v20 = vadd.f32 %v2047_v48, %v596_v19  ;;  %v2064_v21 = vpop.f32.mrb[10].mxu0  ;;  %1572 = vmatprep.subr.bf16.mxu1 %v1701_v17 }
 0x1a4   :  { %v600_v27 = vpop.f32.mrb[11].mxu0 }
 0x1a5   :  { %v682_v28 = vadd.f32 %v2047_v48, %v600_v27  ;;  %v697_v29 = vmax.f32 %v681_v20, 0.0 }
 0x1a6   :  { %1573 = vmatpush3.bf16.msra.mxu1 %v1701_v17 }
 0x1a7   :  { %v698_v30 = vmax.f32 %v682_v28, 0.0  ;;  %1574 = vmatprep.subr.bf16.mxu1 %v1702_v26 }
 0x1a9   :  { %v727_v32 = vpack.c.bf16 %v698_v30, %v697_v29 }
 0x1aa   :  { %1575 = vmatpush3.bf16.msra.mxu1 %v1702_v26 }
 0x1ab   :  { %v2067_v33 = vpop.f32.mrb[12].mxu0  ;;  %1556 = vmatprep.mubr.bf16.mxu1 %v727_v32  ;;  %1576 = vmatprep.subr.bf16.mxu1 %v1703_v31 }
 0x1ac   :  { %v606_v37 = vpop.f32.mrb[13].mxu0 }
 0x1ad   :  { %v683_v38 = vadd.f32 %v2047_v48, %v606_v37  ;;  %v2070_v41 = vpop.f32.mrb[14].mxu0 }
 0x1ae   :  { %v610_v42 = vpop.f32.mrb[15].mxu0  ;;  %1577 = vmatpush3.bf16.msra.mxu1 %v1703_v31 }
 0x1af   :  { %v684_v43 = vadd.f32 %v2047_v48, %v610_v42  ;;  %1578 = vmatprep.subr.bf16.mxu1 %v1704_v34  ;;  %v699_v44 = vmax.f32 %v683_v38, 0.0 }
 0x1b1   :  { %v700_v45 = vmax.f32 %v684_v43, 0.0 }
 0x1b2   :  { %1579 = vmatpush3.bf16.msra.mxu1 %v1704_v34 }
 0x1b3   :  { %v728_v62 = vpack.c.bf16 %v700_v45, %v699_v44 }
 0x1b5   :  { %1557 = vmatmul.mubr.bf16.gmra.mrb[4].mxu1 %v728_v62  ;;  %v1705_v62 = vld [vmem:[#allocation5 + $0x164] ss:$8 sps:$4 sm:$0xff]  }
 0x1b6   :  { %1580 = vmatprep.subr.bf16.mxu1 %v1705_v62 }
 0x1b7   :  { %1581 = vmatpush3.bf16.msra.mxu1 %v1705_v62 }
 0x1b9   :  { %v2073_v61 = vpop.f32.mrb[16].mxu0 }
 0x1ba   :  { %v616_v46 = vpop.f32.mrb[17].mxu0 }
 0x1bb   :  { %v685_v47 = vadd.f32 %v2047_v48, %v616_v46  ;;  %v2076_v4 = vpop.f32.mrb[18].mxu0  ;;  %v1706_v46 = vld [vmem:[#allocation5 + $0x174] ss:$8 sps:$4 sm:$0xff]  }
 0x1bc   :  { %v620_v50 = vpop.f32.mrb[19].mxu0  ;;  %1582 = vmatprep.subr.bf16.mxu1 %v1706_v46 }
 0x1bd   :  { %v686_v51 = vadd.f32 %v2047_v48, %v620_v50  ;;  %v701_v53 = vmax.f32 %v685_v47, 0.0  ;;  %1583 = vmatpush3.bf16.msra.mxu1 %v1706_v46  ;;  %v1267_v47 = vmul.f32 %v1895_v25, %v1895_v25  ;;  %v1268_v50 = vmul.f32 %v1961_v15, %v1961_v15 }
 0x1be   :  { %v1270_v25 = vmul.f32 %v1973_v35, %v1973_v35 }
 0x1bf   :  { %v702_v54 = vmax.f32 %v686_v51, 0.0  ;;  %1284 = vadd.xlane.f32.xlu1 %v1267_v47  ;;  %v1276_v51 = vmul.f32 %v2011_v39, %v2011_v39 }
 0x1c1   :  { %v729_v63 = vpack.c.bf16 %v702_v54, %v701_v53  ;;  %v1269_v53 = vmul.f32 %v1963_v16, %v1963_v16  ;;  %v1271_v54 = vmul.f32 %v1975_v36, %v1975_v36 }
 0x1c3   :  { %v2079_v0 = vpop.f32.mrb[20].mxu0  ;;  %1560 = vmatprep.mubr.bf16.mxu1 %v729_v63  ;;  %1286 = vadd.xlane.f32.xlu1 %v1268_v50  ;;  %v1273_v63 = vmul.f32 %v1989_v58, %v1989_v58 }
 0x1c4   :  { %v626_v1 = vpop.f32.mrb[21].mxu0 }
 0x1c5   :  { %v687_v3 = vadd.f32 %v2047_v48, %v626_v1  ;;  %v2082_v5 = vpop.f32.mrb[22].mxu0  ;;  %v1274_v1 = vmul.f32 %v1997_v11, %v1997_v11 }
 0x1c6   :  { %v630_v7 = vpop.f32.mrb[23].mxu0 }
 0x1c7   :  { %v688_v8 = vadd.f32 %v2047_v48, %v630_v7  ;;  %v703_v9 = vmax.f32 %v687_v3, 0.0  ;;  %1288 = vadd.xlane.f32.xlu1 %v1269_v53  ;;  %v1275_v3 = vmul.f32 %v1999_v12, %v1999_v12  ;;  %v1277_v7 = vmul.f32 %v2013_v40, %v2013_v40 }
 0x1c9   :  { %v704_v10 = vmax.f32 %v688_v8, 0.0  ;;  %v735_v8 = vsub.s32 3, %v1936_v57 }
 0x1cb   :  { %v730_v13 = vpack.c.bf16 %v704_v10, %v703_v9  ;;  %1290 = vadd.xlane.f32.xlu1 %v1270_v25  ;;  %v736_v9 = vrot.slane %v1943_v60, %v735_v8 }
 0x1cd   :  { %1561 = vmatmul.mubr.bf16.gmra.mrb[8].mxu1 %v730_v13 }
 0x1cf   :  { %1292 = vadd.xlane.f32.xlu1 %v1271_v54 }
 0x1d1   :  { %v2085_v14 = vpop.f32.mrb[24].mxu0 }
 0x1d2   :  { %v636_v17 = vpop.f32.mrb[25].mxu0 }
 0x1d3   :  { %v689_v19 = vadd.f32 %v2047_v48, %v636_v17  ;;  %v2088_v20 = vpop.f32.mrb[26].mxu0 }
 0x1d4   :  { %v640_v26 = vpop.f32.mrb[27].mxu0 }
 0x1d5   :  { %v690_v27 = vadd.f32 %v2047_v48, %v640_v26  ;;  %v705_v28 = vmax.f32 %v689_v19, 0.0 }
 0x1d7   :  { %v706_v29 = vmax.f32 %v690_v27, 0.0 }
 0x1d9   :  { %v731_v30 = vpack.c.bf16 %v706_v29, %v705_v28 }
 0x1db   :  { %v2091_v31 = vpop.f32.mrb[28].mxu0  ;;  %1564 = vmatprep.mubr.bf16.mxu1 %v731_v30 }
 0x1dc   :  { %v646_v32 = vpop.f32.mrb[29].mxu0 }
 0x1dd   :  { %v691_v34 = vadd.f32 %v2047_v48, %v646_v32  ;;  %v2094_v37 = vpop.f32.mrb[30].mxu0 }
 0x1de   :  { %v650_v38 = vpop.f32.mrb[31].mxu0 }
 0x1df   :  { %v692_v42 = vadd.f32 %v2047_v48, %v650_v38  ;;  %v707_v43 = vmax.f32 %v691_v34, 0.0  ;;  %v1266_v48 = vmul.f32 %v1893_v24, %v1893_v24  ;;  %v1272_v24 = vmul.f32 %v1987_v56, %v1987_v56 }
 0x1e1   :  { %v708_v44 = vmax.f32 %v692_v42, 0.0  ;;  %1282 = vadd.xlane.f32.xlu0 %v1266_v48  ;;  %1294 = vadd.xlane.f32.xlu1 %v1272_v24 }
 0x1e3   :  { %v732_v45 = vpack.c.bf16 %v708_v44, %v707_v43 }
 0x1e5   :  { %1565 = vmatmul.mubr.bf16.gmra.mrb[12].mxu1 %v732_v45  ;;  %1302 = vadd.xlane.f32.xlu0 %v1276_v51 }
 0x1e6   :  { %1296 = vadd.xlane.f32.xlu1 %v1273_v63 }
 0x1ea   :  { %1298 = vadd.xlane.f32.xlu1 %v1274_v1 }
 0x1ee   :  { %1300 = vadd.xlane.f32.xlu1 %v1275_v3 }
 0x1f2   :  { %1304 = vadd.xlane.f32.xlu1 %v1277_v7 }
 0x270   :  { %v1554_v10 = vpop.f32.mrb[0].mxu1 }
 0x271   :  { %v828_v13 = vadd.f32 %v1554_v10, %v736_v9  ;;  %v819_v17 = vpop.f32.mrb[1].mxu1 }
 0x272   :  { %v820_v19 = vadd.f32 %v819_v17, %v736_v9  ;;  %v1555_v26 = vpop.f32.mrb[2].mxu1 }
 0x273   :  { %v831_v27 = vadd.f32 %v1555_v26, %v736_v9  ;;  %v822_v28 = vpop.f32.mrb[3].mxu1  ;;  %v884_v30 = vmax.f32 %v828_v13, 0.0 }
 0x274   :  { %v823_v29 = vadd.f32 %v822_v28, %v736_v9  ;;  %v882_v34 = vmax.f32 %v820_v19, 0.0 }
 0x275   :  { %v885_v32 = vmax.f32 %v831_v27, 0.0 }
 0x276   :  { %v883_v38 = vmax.f32 %v823_v29, 0.0 }
 0x277   :  { %v899_v42 = vpack.c.bf16 %v885_v32, %v884_v30 }
 0x278   :  { %v898_v43 = vpack.c.bf16 %v883_v38, %v882_v34 }
 0x27a   :  { %1584 = vmatprep.mubr.bf16.mxu1 %v898_v43 }
 0x27b   :  { %1585 = vmatmul.mubr.bf16.vlgmr.msra.gmra.mrb[16].mxu1 %v899_v42 }
 0x288   :  { %v1558_v44 = vpop.f32.mrb[4].mxu1 }
 0x289   :  { %v844_v45 = vadd.f32 %v1558_v44, %v736_v9  ;;  %v835_v62 = vpop.f32.mrb[5].mxu1 }
 0x28a   :  { %v836_v46 = vadd.f32 %v835_v62, %v736_v9  ;;  %v1559_v47 = vpop.f32.mrb[6].mxu1 }
 0x28b   :  { %v847_v50 = vadd.f32 %v1559_v47, %v736_v9  ;;  %v838_v48 = vpop.f32.mrb[7].mxu1  ;;  %v888_v53 = vmax.f32 %v844_v45, 0.0 }
 0x28c   :  { %v839_v51 = vadd.f32 %v838_v48, %v736_v9  ;;  %v886_v54 = vmax.f32 %v836_v46, 0.0 }
 0x28d   :  { %v889_v25 = vmax.f32 %v847_v50, 0.0 }
 0x28e   :  { %v887_v24 = vmax.f32 %v839_v51, 0.0 }
 0x28f   :  { %v901_v63 = vpack.c.bf16 %v889_v25, %v888_v53 }
 0x290   :  { %v900_v1 = vpack.c.bf16 %v887_v24, %v886_v54  ;;  %v1278_v24 = vmul.f32 %v2021_v55, %v2021_v55 }
 0x292   :  { %1588 = vmatprep.mubr.bf16.mxu1 %v900_v1  ;;  %1306 = vadd.xlane.f32.xlu0 %v1278_v24  ;;  %v655_v1 = vsub.s32 1, %v1936_v57 }
 0x293   :  { %1589 = vmatmul.mubr.bf16.gmra.mrb[20].mxu1 %v901_v63  ;;  %v1279_v63 = vmul.f32 %v2023_v59, %v2023_v59 }
 0x295   :  { %1308 = vadd.xlane.f32.xlu1 %v1279_v63  ;;  %v1740_v63 = vld [vmem:[#allocation2 + $0x8] sm:$0xff] }
 0x2a0   :  { %v1562_v3 = vpop.f32.mrb[8].mxu1 }
 0x2a1   :  { %v860_v7 = vadd.f32 %v1562_v3, %v736_v9  ;;  %v851_v8 = vpop.f32.mrb[9].mxu1  ;;  %v2130_v3 = vrot.slane %v1943_v60, %v655_v1 }
 0x2a2   :  { %v852_v10 = vadd.f32 %v851_v8, %v736_v9  ;;  %v1563_v13 = vpop.f32.mrb[10].mxu1 }
 0x2a3   :  { %v863_v17 = vadd.f32 %v1563_v13, %v736_v9  ;;  %v854_v19 = vpop.f32.mrb[11].mxu1  ;;  %v892_v27 = vmax.f32 %v860_v7, 0.0  ;;  %v659_v7 = vadd.f32 %v2130_v3, %v2055_v2  ;;  %v81_v13 = vld [vmem:[%s2335_s2 + $0x10] sm:$0xff]  ;;  %v658_v2 = vadd.f32 %v2130_v3, %v2052_v52 }
 0x2a4   :  { %v855_v26 = vadd.f32 %v854_v19, %v736_v9  ;;  %v890_v29 = vmax.f32 %v852_v10, 0.0  ;;  %v657_v10 = vadd.f32 %v2130_v3, %v2049_v49  ;;  %v80_v49 = vld [vmem:[%s2335_s2 + $0x8] sm:$0xff] }
 0x2a5   :  { %v893_v28 = vmax.f32 %v863_v17, 0.0  ;;  %v660_v17 = vadd.f32 %v2130_v3, %v2058_v6 }
 0x2a6   :  { %v891_v30 = vmax.f32 %v855_v26, 0.0  ;;  %v1083_v26 = vadd.f32 %v659_v7, %v81_v13 }
 0x2a7   :  { %v903_v32 = vpack.c.bf16 %v893_v28, %v892_v27 }
 0x2a8   :  { %v902_v34 = vpack.c.bf16 %v891_v30, %v890_v29 }
 0x2aa   :  { %1592 = vmatprep.mubr.bf16.mxu1 %v902_v34 }
 0x2ab   :  { %1593 = vmatmul.mubr.bf16.gmra.mrb[24].mxu1 %v903_v32 }
 0x2b8   :  { %v1566_v38 = vpop.f32.mrb[12].mxu1 }
 0x2b9   :  { %v876_v42 = vadd.f32 %v1566_v38, %v736_v9  ;;  %v867_v43 = vpop.f32.mrb[13].mxu1 }
 0x2ba   :  { %v868_v44 = vadd.f32 %v867_v43, %v736_v9  ;;  %v1567_v45 = vpop.f32.mrb[14].mxu1 }
 0x2bb   :  { %v879_v62 = vadd.f32 %v1567_v45, %v736_v9  ;;  %v870_v46 = vpop.f32.mrb[15].mxu1  ;;  %v896_v50 = vmax.f32 %v876_v42, 0.0  ;;  %v1082_v42 = vadd.f32 %v658_v2, %v80_v49 }
 0x2bc   :  { %v871_v47 = vadd.f32 %v870_v46, %v736_v9  ;;  %v894_v51 = vmax.f32 %v868_v44, 0.0  ;;  %v908_v9 = vsub.s32 4, %v1936_v57  ;;  %v79_v57 = vld [vmem:[%s2335_s2] sm:$0xff] }
 0x2bd   :  { %v897_v48 = vmax.f32 %v879_v62, 0.0  ;;  %v1081_v29 = vadd.f32 %v657_v10, %v79_v57 }
 0x2be   :  { %v895_v53 = vmax.f32 %v871_v47, 0.0  ;;  %v2135_v8 = vrot.slane %v1943_v60, %v908_v9  ;;  %v82_v60 = vld [vmem:[%s2335_s2 + $0x18] sm:$0xff]  ;;  %v1739_v47 = vld [vmem:[#allocation2] sm:$0xff] }
 0x2bf   :  { %v905_v25 = vpack.c.bf16 %v897_v48, %v896_v50  ;;  %v1084_v32 = vadd.f32 %v660_v17, %v82_v60 }
 0x2c0   :  { %v904_v54 = vpack.c.bf16 %v895_v53, %v894_v51 }
 0x2c2   :  { %1596 = vmatprep.mubr.bf16.mxu1 %v904_v54 }
 0x2c3   :  { %1597 = vmatmul.mubr.bf16.gmra.mrb[28].mxu1 %v905_v25 }
 0x34e   :  { %v1586_v19 = vpop.f32.mrb[16].mxu1 }
 0x34f   :  { %v985_v27 = vadd.f32 %v1586_v19, %v2135_v8  ;;  %v976_v28 = vpop.f32.mrb[17].mxu1 }
 0x350   :  { %v977_v30 = vadd.f32 %v976_v28, %v2135_v8  ;;  %v1587_v6 = vpop.f32.mrb[18].mxu1 }
 0x351   :  { %v1099_v34 = vadd.f32 %v1083_v26, %v985_v27  ;;  %v988_v52 = vadd.f32 %v1587_v6, %v2135_v8  ;;  %v979_v38 = vpop.f32.mrb[19].mxu1  ;;  %v1041_v25 = vand.u32 2147483647, %v985_v27 }
 0x352   :  { %v1097_v43 = vadd.f32 %v1081_v29, %v977_v30  ;;  %v980_v44 = vadd.f32 %v979_v38, %v2135_v8  ;;  %v1039_v45 = vand.u32 2147483647, %v977_v30  ;;  %v664_v38 = vadd.f32 %v2130_v3, %v2070_v41 }
 0x353   :  { %v1100_v62 = vadd.f32 %v1084_v32, %v988_v52  ;;  %v1220_v46 = vmul.f32 %v1099_v34, %v1099_v34  ;;  %v1115_v54 = vsub.f32 %v1099_v34, %v1961_v15  ;;  %v1042_v9 = vand.u32 2147483647, %v988_v52  ;;  %v83_v52 = vld [vmem:[%s2335_s2 + $0x20] sm:$0xff] }
 0x354   :  { %v1113_v50 = vsub.f32 %v1097_v43, %v1739_v47  ;;  %v1040_v48 = vand.u32 2147483647, %v980_v44  ;;  %v1098_v51 = vadd.f32 %v1082_v42, %v980_v44  ;;  %v1218_v53 = vmul.f32 %v1097_v43, %v1097_v43 }
 0x355   :  { %1238 = vadd.xlane.f32.xlu0 %v1220_v46  ;;  %v1116_v7 = vsub.f32 %v1100_v62, %v1963_v16  ;;  %v1172_v10 = vmul.f32 %v1099_v34, %v1961_v15  ;;  %v1173_v2 = vmul.f32 %v1100_v62, %v1963_v16  ;;  %v1131_v60 = vmul.f32 %v1115_v54, %v1115_v54  ;;  %v85_v34 = vld [vmem:[%s2335_s2 + $0x30] sm:$0xff] }
 0x356   :  { %v1055_v24 = vadd.f32 %v1040_v48, %v1039_v45  ;;  %v1114_v1 = vsub.f32 %v1098_v51, %v1740_v63  ;;  %1234 = vadd.xlane.f32.xlu1 %v1218_v53  ;;  %v1129_v13 = vmul.f32 %v1113_v50, %v1113_v50  ;;  %v1170_v26 = vmul.f32 %v1739_v47, %v1097_v43  ;;  %v84_v43 = vld [vmem:[%s2335_s2 + $0x28] sm:$0xff] }
 0x357   :  { %v1132_v27 = vmul.f32 %v1116_v7, %v1116_v7  ;;  %v1171_v29 = vmul.f32 %v1740_v63, %v1098_v51  ;;  %v1221_v6 = vmul.f32 %v1100_v62, %v1100_v62  ;;  %v663_v15 = vadd.f32 %v2130_v3, %v2067_v33  ;;  %v86_v33 = vld [vmem:[%s2335_s2 + $0x38] sm:$0xff] }
 0x358   :  { %v1056_v57 = vadd.f32 %v1055_v24, %v1041_v25  ;;  %v1130_v17 = vmul.f32 %v1114_v1, %v1114_v1  ;;  %v1219_v32 = vmul.f32 %v1098_v51, %v1098_v51  ;;  %v661_v16 = vadd.f32 %v2130_v3, %v2061_v18 }
 0x359   :  { %1190 = vadd.xlane.f32.xlu0 %v1172_v10  ;;  %v662_v42 = vadd.f32 %v2130_v3, %v2064_v21  ;;  %v1087_v44 = vadd.f32 %v663_v15, %v85_v34  ;;  %v1088_v50 = vadd.f32 %v664_v38, %v86_v33 }
 0x35a   :  { %v1145_v19 = vadd.f32 %v1130_v17, %v1129_v13  ;;  %1192 = vadd.xlane.f32.xlu1 %v1173_v2  ;;  %v1057_v49 = vadd.f32 %v1056_v57, %v1042_v9  ;;  %v1085_v46 = vadd.f32 %v661_v16, %v83_v52 }
 0x35b   :  { %v1086_v53 = vadd.f32 %v662_v42, %v84_v43  ;;  %v87_v43 = vld [vmem:[%s2335_s2 + $0x40] sm:$0xff] }
 0x35c   :  { %v1146_v28 = vadd.f32 %v1145_v19, %v1131_v60 }
 0x35d   :  { %1186 = vadd.xlane.f32.xlu0 %v1170_v26 }
 0x35e   :  { %1188 = vadd.xlane.f32.xlu1 %v1171_v29  ;;  %v1147_v30 = vadd.f32 %v1146_v28, %v1132_v27 }
 0x361   :  { %1240 = vadd.xlane.f32.xlu0 %v1221_v6 }
 0x365   :  { %1236 = vadd.xlane.f32.xlu0 %v1219_v32 }
 0x366   :  { %v1590_v18 = vpop.f32.mrb[20].mxu1 }
 0x367   :  { %v1001_v45 = vadd.f32 %v1590_v18, %v2135_v8  ;;  %v992_v62 = vpop.f32.mrb[21].mxu1  ;;  %v89_v18 = vld [vmem:[%s2335_s2 + $0x50] sm:$0xff] }
 0x368   :  { %v993_v41 = vadd.f32 %v992_v62, %v2135_v8  ;;  %v1591_v47 = vpop.f32.mrb[22].mxu1 }
 0x369   :  { %v1103_v48 = vadd.f32 %v1087_v44, %v1001_v45  ;;  %v1004_v21 = vadd.f32 %v1591_v47, %v2135_v8  ;;  %v995_v51 = vpop.f32.mrb[23].mxu1  ;;  %v1045_v57 = vand.u32 2147483647, %v1001_v45  ;;  %v90_v44 = vld [vmem:[%s2335_s2 + $0x58] sm:$0xff]  ;;  %v88_v45 = vld [vmem:[%s2335_s2 + $0x48] sm:$0xff] }
 0x36a   :  { %v1043_v25 = vand.u32 2147483647, %v993_v41  ;;  %v1101_v54 = vadd.f32 %v1085_v46, %v993_v41  ;;  %v996_v24 = vadd.f32 %v995_v51, %v2135_v8 }
 0x36b   :  { %v2187_v63 = vadd.f32 %v1088_v50, %v1004_v21  ;;  %v1224_v1 = vmul.f32 %v1103_v48, %v1103_v48  ;;  %v1119_v17 = vsub.f32 %v1103_v48, %v1987_v56  ;;  %v1046_v27 = vand.u32 2147483647, %v1004_v21 }
 0x36c   :  { %v1058_v9 = vadd.f32 %v1057_v49, %v1043_v25  ;;  %v1117_v7 = vsub.f32 %v1101_v54, %v1973_v35  ;;  %v1044_v10 = vand.u32 2147483647, %v996_v24  ;;  %v1102_v13 = vadd.f32 %v1086_v53, %v996_v24 }
 0x36d   :  { %1246 = vadd.xlane.f32.xlu0 %v1224_v1  ;;  %v1176_v28 = vmul.f32 %v1103_v48, %v1987_v56  ;;  %v1120_v49 = vsub.f32 %v2187_v63, %v1989_v58  ;;  %v1135_v32 = vmul.f32 %v1119_v17, %v1119_v17  ;;  %v1222_v52 = vmul.f32 %v1101_v54, %v1101_v54 }
 0x36e   :  { %v1133_v2 = vmul.f32 %v1117_v7, %v1117_v7  ;;  %v1059_v60 = vadd.f32 %v1058_v9, %v1044_v10  ;;  %v1118_v19 = vsub.f32 %v1102_v13, %v1975_v36  ;;  %v1175_v26 = vmul.f32 %v1102_v13, %v1975_v36 }
 0x36f   :  { %v1136_v38 = vmul.f32 %v1120_v49, %v1120_v49  ;;  %v1174_v36 = vmul.f32 %v1101_v54, %v1973_v35  ;;  %v667_v56 = vadd.f32 %v2130_v3, %v2079_v0  ;;  %v1225_v58 = vmul.f32 %v2187_v63, %v2187_v63 }
 0x370   :  { %v1148_v29 = vadd.f32 %v1147_v30, %v1133_v2  ;;  %v1060_v6 = vadd.f32 %v1059_v60, %v1045_v57  ;;  %v1134_v15 = vmul.f32 %v1118_v19, %v1118_v19  ;;  %1196 = vadd.xlane.f32.xlu1 %v1175_v26  ;;  %v665_v30 = vadd.f32 %v2130_v3, %v2073_v61 }
 0x371   :  { %1198 = vadd.xlane.f32.xlu0 %v1176_v28  ;;  %v668_v35 = vadd.f32 %v2130_v3, %v2082_v5  ;;  %v666_v0 = vadd.f32 %v2130_v3, %v2076_v4  ;;  %v1091_v62 = vadd.f32 %v667_v56, %v89_v18  ;;  %v1223_v47 = vmul.f32 %v1102_v13, %v1102_v13  ;;  %v91_v18 = vld [vmem:[%s2335_s2 + $0x60] sm:$0xff] }
 0x372   :  { %v1149_v16 = vadd.f32 %v1148_v29, %v1134_v15  ;;  %v1061_v34 = vadd.f32 %v1060_v6, %v1046_v27  ;;  %v1089_v50 = vadd.f32 %v665_v30, %v87_v43  ;;  %v671_v56 = vadd.f32 %v2130_v3, %v2091_v31  ;;  %v93_v30 = vld [vmem:[%s2335_s2 + $0x70] sm:$0xff]  ;;  %v94_v31 = vld [vmem:[%s2335_s2 + $0x78] sm:$0xff] }
 0x373   :  { %v1092_v21 = vadd.f32 %v668_v35, %v90_v44  ;;  %v1090_v25 = vadd.f32 %v666_v0, %v88_v45  ;;  %v672_v43 = vadd.f32 %v2130_v3, %v2094_v37  ;;  %v670_v35 = vadd.f32 %v2130_v3, %v2088_v20 }
 0x374   :  { %v1150_v42 = vadd.f32 %v1149_v16, %v1135_v32  ;;  %v1095_v44 = vadd.f32 %v671_v56, %v93_v30 }
 0x375   :  { %1242 = vadd.xlane.f32.xlu0 %v1222_v52 }
 0x376   :  { %v1151_v33 = vadd.f32 %v1150_v42, %v1136_v38 }
 0x379   :  { %1194 = vadd.xlane.f32.xlu0 %v1174_v36 }
 0x37d   :  { %1248 = vadd.xlane.f32.xlu0 %v1225_v58  ;;  %v669_v58 = vadd.f32 %v2130_v3, %v2085_v14  ;;  %v92_v14 = vld [vmem:[%s2335_s2 + $0x68] sm:$0xff] }
 0x37e   :  { %v1594_v61 = vpop.f32.mrb[24].mxu1 }
 0x37f   :  { %v1017_v46 = vadd.f32 %v1594_v61, %v2135_v8  ;;  %v1008_v41 = vpop.f32.mrb[25].mxu1 }
 0x380   :  { %v1009_v5 = vadd.f32 %v1008_v41, %v2135_v8  ;;  %v1595_v48 = vpop.f32.mrb[26].mxu1  ;;  %v1096_v41 = vadd.f32 %v672_v43, %v94_v31 }
 0x381   :  { %v2221_v4 = vadd.f32 %v1091_v62, %v1017_v46  ;;  %v1020_v51 = vadd.f32 %v1595_v48, %v2135_v8  ;;  %v1011_v53 = vpop.f32.mrb[27].mxu1  ;;  %1244 = vadd.xlane.f32.xlu0 %v1223_v47  ;;  %v1049_v2 = vand.u32 2147483647, %v1017_v46  ;;  %v1093_v62 = vadd.f32 %v669_v58, %v91_v18  ;;  %v1743_v58 = vld [vmem:[#allocation2 + $0x48] sm:$0xff] }
 0x382   :  { %v1047_v54 = vand.u32 2147483647, %v1009_v5  ;;  %v2224_v24 = vadd.f32 %v1089_v50, %v1009_v5  ;;  %v1012_v1 = vadd.f32 %v1011_v53, %v2135_v8  ;;  %v1094_v50 = vadd.f32 %v670_v35, %v92_v14  ;;  %v1283_v35 = vpop.xlane.xlu0 %1282 }
 0x383   :  { %v2227_v9 = vadd.f32 %v1092_v21, %v1020_v51  ;;  %v1228_v7 = vmul.f32 %v2221_v4, %v2221_v4  ;;  %v1123_v19 = vsub.f32 %v2221_v4, %v2011_v39  ;;  %v1050_v29 = vand.u32 2147483647, %v1020_v51 }
 0x384   :  { %v1062_v10 = vadd.f32 %v1061_v34, %v1047_v54  ;;  %v1121_v13 = vsub.f32 %v2224_v24, %v1997_v11  ;;  %v1048_v57 = vand.u32 2147483647, %v1012_v1  ;;  %v2233_v17 = vadd.f32 %v1090_v25, %v1012_v1 }
 0x385   :  { %1254 = vadd.xlane.f32.xlu1 %v1228_v7  ;;  %v1226_v60 = vmul.f32 %v2224_v24, %v2224_v24  ;;  %v1124_v11 = vsub.f32 %v2227_v9, %v2013_v40  ;;  %v1229_v32 = vmul.f32 %v2227_v9, %v2227_v9  ;;  %v1139_v16 = vmul.f32 %v1123_v19, %v1123_v19 }
 0x386   :  { %v1137_v26 = vmul.f32 %v1121_v13, %v1121_v13  ;;  %v1063_v27 = vadd.f32 %v1062_v10, %v1048_v57  ;;  %v1122_v28 = vsub.f32 %v2233_v17, %v1999_v12  ;;  %v1227_v12 = vmul.f32 %v2233_v17, %v2233_v17  ;;  %v2290_v31 = vpop.xlane.xlu0 %1302 }
 0x387   :  { %1250 = vadd.xlane.f32.xlu0 %v1226_v60  ;;  %v1140_v38 = vmul.f32 %v1124_v11, %v1124_v11  ;;  %v1179_v30 = vmul.f32 %v1743_v58, %v2233_v17  ;;  %v1181_v18 = vmul.f32 %v2227_v9, %v2013_v40 }
 0x388   :  { %v1152_v49 = vadd.f32 %v1151_v33, %v1137_v26  ;;  %v1064_v6 = vadd.f32 %v1063_v27, %v1049_v2  ;;  %v1138_v15 = vmul.f32 %v1122_v28, %v1122_v28  ;;  %v1280_v33 = vmul.f32 %v2035_v22, %v2035_v22 }
 0x38a   :  { %v1153_v34 = vadd.f32 %v1152_v49, %v1138_v15  ;;  %v1065_v52 = vadd.f32 %v1064_v6, %v1050_v29  ;;  %v2292_v9 = vpop.xlane.xlu0 %1306 }
 0x38b   :  { %1256 = vadd.xlane.f32.xlu0 %v1229_v32 }
 0x38c   :  { %v1154_v42 = vadd.f32 %v1153_v34, %v1139_v16  ;;  %v1741_v16 = vld [vmem:[#allocation2 + $0x38] sm:$0xff] }
 0x38d   :  { %v1177_v34 = vmul.f32 %v1741_v16, %v2187_v63 }
 0x38e   :  { %v1155_v36 = vadd.f32 %v1154_v42, %v1140_v38  ;;  %v1281_v42 = vmul.f32 %v2037_v23, %v2037_v23 }
 0x38f   :  { %1252 = vadd.xlane.f32.xlu0 %v1227_v12  ;;  %v1742_v12 = vld [vmem:[#allocation2 + $0x40] sm:$0xff] }
 0x393   :  { %1310 = vadd.xlane.f32.xlu0 %v1280_v33  ;;  %v1178_v33 = vmul.f32 %v1742_v12, %v2224_v24 }
 0x396   :  { %v1598_v0 = vpop.f32.mrb[28].mxu1 }
 0x397   :  { %v1033_v61 = vadd.f32 %v1598_v0, %v2135_v8  ;;  %v1024_v45 = vpop.f32.mrb[29].mxu1 }
 0x398   :  { %v1025_v46 = vadd.f32 %v1024_v45, %v2135_v8  ;;  %v1599_v37 = vpop.f32.mrb[30].mxu1 }
 0x399   :  { %v1111_v47 = vadd.f32 %v1095_v44, %v1033_v61  ;;  %v1036_v20 = vadd.f32 %v1599_v37, %v2135_v8  ;;  %v1027_v3 = vpop.f32.mrb[31].mxu1  ;;  %v1053_v10 = vand.u32 2147483647, %v1033_v61 }
 0x39a   :  { %v1051_v5 = vand.u32 2147483647, %v1025_v46  ;;  %v1109_v48 = vadd.f32 %v1093_v62, %v1025_v46  ;;  %v1028_v21 = vadd.f32 %v1027_v3, %v2135_v8 }
 0x39b   :  { %v1112_v51 = vadd.f32 %v1096_v41, %v1036_v20  ;;  %v1232_v53 = vmul.f32 %v1111_v47, %v1111_v47  ;;  %v1054_v19 = vand.u32 2147483647, %v1036_v20  ;;  %v1127_v27 = vsub.f32 %v1111_v47, %v2035_v22 }
 0x39c   :  { %v1066_v25 = vadd.f32 %v1065_v52, %v1051_v5  ;;  %v1125_v54 = vsub.f32 %v1109_v48, %v2021_v55  ;;  %v1052_v1 = vand.u32 2147483647, %v1028_v21  ;;  %v1110_v7 = vadd.f32 %v1094_v50, %v1028_v21 }
 0x39d   :  { %1262 = vadd.xlane.f32.xlu1 %v1232_v53  ;;  %v1230_v26 = vmul.f32 %v1109_v48, %v1109_v48  ;;  %v1128_v28 = vsub.f32 %v1112_v51, %v2037_v23  ;;  %v1233_v11 = vmul.f32 %v1112_v51, %v1112_v51  ;;  %v1143_v15 = vmul.f32 %v1127_v27, %v1127_v27 }
 0x39e   :  { %v1141_v13 = vmul.f32 %v1125_v54, %v1125_v54  ;;  %v1067_v57 = vadd.f32 %v1066_v25, %v1052_v1  ;;  %v1126_v2 = vsub.f32 %v1110_v7, %v2023_v59  ;;  %v1231_v60 = vmul.f32 %v1110_v7, %v1110_v7 }
 0x39f   :  { %v1144_v52 = vmul.f32 %v1128_v28, %v1128_v28  ;;  %v1182_v63 = vmul.f32 %v1109_v48, %v2021_v55  ;;  %v1184_v24 = vmul.f32 %v1111_v47, %v2035_v22  ;;  %v1183_v43 = vmul.f32 %v1110_v7, %v2023_v59 }
 0x3a0   :  { %1260 = vadd.xlane.f32.xlu0 %v1231_v60  ;;  %v1068_v8 = vadd.f32 %v1067_v57, %v1053_v10  ;;  %v1142_v29 = vmul.f32 %v1126_v2, %v1126_v2  ;;  %v1156_v49 = vadd.f32 %v1155_v36, %v1141_v13  ;;  %v1180_v36 = vmul.f32 %v2221_v4, %v2011_v39  ;;  %v1285_v4 = vpop.xlane.xlu1 %1284 }
 0x3a1   :  { %1258 = vadd.xlane.f32.xlu1 %v1230_v26  ;;  %v1185_v39 = vmul.f32 %v1112_v51, %v2037_v23 }
 0x3a2   :  { %v1069_v6 = vadd.f32 %v1068_v8, %v1054_v19  ;;  %v1157_v32 = vadd.f32 %v1156_v49, %v1142_v29 }
 0x3a4   :  { %1264 = vadd.xlane.f32.xlu0 %v1233_v11  ;;  %v1158_v38 = vadd.f32 %v1157_v32, %v1143_v15  ;;  %v1287_v17 = vpop.xlane.xlu1 %1286 }
 0x3a5   :  { %1200 = vadd.xlane.f32.xlu1 %v1177_v34 }
 0x3a6   :  { %v1159_v56 = vadd.f32 %v1158_v38, %v1144_v52 }
 0x3a8   :  { %1202 = vadd.xlane.f32.xlu0 %v1178_v33  ;;  %v1289_v55 = vpop.xlane.xlu1 %1288 }
 0x3a9   :  { %1312 = vadd.xlane.f32.xlu1 %v1281_v42 }
 0x3ac   :  { %1206 = vadd.xlane.f32.xlu0 %v1180_v36  ;;  %v1291_v40 = vpop.xlane.xlu1 %1290 }
 0x3ad   :  { %1204 = vadd.xlane.f32.xlu1 %v1179_v30 }
 0x3b0   :  { %1210 = vadd.xlane.f32.xlu0 %v1182_v63  ;;  %v1293_v0 = vpop.xlane.xlu1 %1292 }
 0x3b1   :  { %1208 = vadd.xlane.f32.xlu1 %v1181_v18 }
 0x3b4   :  { %1214 = vadd.xlane.f32.xlu0 %v1184_v24  ;;  %v1295_v14 = vpop.xlane.xlu1 %1294 }
 0x3b5   :  { %1212 = vadd.xlane.f32.xlu1 %v1183_v43 }
 0x3b8   :  { %1070 = vadd.xlane.f32.xlu0 %v1069_v6  ;;  %v1297_v61 = vpop.xlane.xlu1 %1296 }
 0x3b9   :  { %1216 = vadd.xlane.f32.xlu1 %v1185_v39 }
 0x3bc   :  { %v1299_v23 = vpop.xlane.xlu1 %1298 }
 0x3bd   :  { %1160 = vadd.xlane.f32.xlu1 %v1159_v56 }
 0x3c0   :  { %v1301_v46 = vpop.xlane.xlu1 %1300 }
 0x3c4   :  { %v2294_v41 = vpop.xlane.xlu1 %1304 }
 0x3c8   :  { %v2298_v3 = vpop.xlane.xlu1 %1308 }
 0x3e2   :  { %v1239_v22 = vpop.xlane.xlu0 %1238 }
 0x3e3   :  { %v1235_v5 = vpop.xlane.xlu1 %1234  ;;  %v1316_v25 = vmul.f32 %v1287_v17, %v1239_v22 }
 0x3e4   :  { %v1314_v51 = vmul.f32 %v1283_v35, %v1235_v5 }
 0x3e5   :  { %v1332_v10 = vmax.f32 %v1316_v25, 1e-16 }
 0x3e6   :  { %v1191_v59 = vpop.xlane.xlu0 %1190  ;;  %v1330_v54 = vmax.f32 %v1314_v51, 1e-16 }
 0x3e7   :  { %v1193_v57 = vpop.xlane.xlu1 %1192 }
 0x3ea   :  { %v1187_v44 = vpop.xlane.xlu0 %1186 }
 0x3eb   :  { %v1189_v28 = vpop.xlane.xlu1 %1188 }
 0x3ee   :  { %v1241_v45 = vpop.xlane.xlu0 %1240 }
 0x3ef   :  { %v1317_v7 = vmul.f32 %v1289_v55, %v1241_v45 }
 0x3f1   :  { %v1333_v60 = vmax.f32 %v1317_v7, 1e-16 }
 0x3f2   :  { %v1237_v62 = vpop.xlane.xlu0 %1236 }
 0x3f3   :  { %v1315_v48 = vmul.f32 %v1285_v4, %v1237_v62 }
 0x3f5   :  { %v1331_v53 = vmax.f32 %v1315_v48, 1e-16 }
 0x3f7   :  { %1707 = vrsqrt.f32 %v1331_v53 }
 0x3f8   :  { %1709 = vrsqrt.f32 %v1330_v54 }
 0x3f9   :  { %1711 = vrsqrt.f32 %v1332_v10 }
 0x3fa   :  { %v1247_v37 = vpop.xlane.xlu0 %1246  ;;  %1713 = vrsqrt.f32 %v1333_v60 }
 0x3fb   :  { %v1320_v29 = vmul.f32 %v1295_v14, %v1247_v37 }
 0x3fd   :  { %v1336_v15 = vmax.f32 %v1320_v29, 1e-16  ;;  %v1197_v32 = vpop.xlane.xlu1 %1196 }
 0x3fe   :  { %v2296_v47 = vpop.xlane.xlu0 %1198 }
 0x401   :  { %v1708_v8 = vpop.eup %1707 }
 0x402   :  { %v1243_v20 = vpop.xlane.xlu0 %1242  ;;  %v1710_v11 = vpop.eup %1709  ;;  %v1363_v6 = vmul.f32 %v1708_v8, %v1189_v28 }
 0x403   :  { %v1318_v13 = vmul.f32 %v1291_v40, %v1243_v20  ;;  %v1362_v34 = vmul.f32 %v1710_v11, %v1187_v44  ;;  %v1712_v52 = vpop.eup %1711 }
 0x404   :  { %v1380_v38 = vsel %vm1378_vm0, %v1363_v6, 0.0  ;;  %v1714_v36 = vpop.eup %1713  ;;  %v1364_v58 = vmul.f32 %v1712_v52, %v1191_v59 }
 0x405   :  { %v1334_v26 = vmax.f32 %v1318_v13, 1e-16  ;;  %v1379_v30 = vsel %vm1378_vm0, %v1362_v34, 0.0  ;;  %v1365_v55 = vmul.f32 %v1714_v36, %v1193_v57 }
 0x406   :  { %v1195_v50 = vpop.xlane.xlu0 %1194  ;;  %v1381_v18 = vadd.f32 %v1380_v38, %v1379_v30  ;;  %v1382_v35 = vsel %vm1378_vm0, %v1364_v58, 0.0 }
 0x407   :  { %1715 = vrsqrt.f32 %v1334_v26  ;;  %v1384_v45 = vsel %vm1378_vm0, %v1365_v55, 0.0 }
 0x40a   :  { %v1249_v21 = vpop.xlane.xlu0 %1248 }
 0x40b   :  { %v1321_v16 = vmul.f32 %v1297_v61, %v1249_v21 }
 0x40d   :  { %v1337_v33 = vmax.f32 %v1321_v16, 1e-16 }
 0x40e   :  { %v1245_v1 = vpop.xlane.xlu0 %1244 }
 0x40f   :  { %v1319_v2 = vmul.f32 %v1293_v0, %v1245_v1  ;;  %v1383_v0 = vadd.f32 %v1382_v35, %v1381_v18 }
 0x411   :  { %v1335_v27 = vmax.f32 %v1319_v2, 1e-16  ;;  %v1716_v63 = vpop.eup %1715  ;;  %v1385_v37 = vadd.f32 %v1384_v45, %v1383_v0 }
 0x412   :  { %v1255_v56 = vpop.xlane.xlu1 %1254  ;;  %v1366_v40 = vmul.f32 %v1716_v63, %v1195_v50 }
 0x413   :  { %1717 = vrsqrt.f32 %v1335_v27  ;;  %v1324_v24 = vmul.f32 %v2290_v31, %v1255_v56 }
 0x414   :  { %v1251_v19 = vpop.xlane.xlu0 %1250  ;;  %1719 = vrsqrt.f32 %v1336_v15  ;;  %v1386_v31 = vsel %vm1378_vm0, %v1366_v40, 0.0 }
 0x415   :  { %v1322_v42 = vmul.f32 %v1299_v23, %v1251_v19  ;;  %1721 = vrsqrt.f32 %v1337_v33  ;;  %v1340_v14 = vmax.f32 %v1324_v24, 1e-16  ;;  %v1387_v48 = vadd.f32 %v1386_v31, %v1385_v37 }
 0x417   :  { %v1338_v43 = vmax.f32 %v1322_v42, 1e-16 }
 0x418   :  { %v1257_v49 = vpop.xlane.xlu0 %1256 }
 0x419   :  { %1723 = vrsqrt.f32 %v1338_v43  ;;  %v1325_v44 = vmul.f32 %v2294_v41, %v1257_v49 }
 0x41a   :  { %1725 = vrsqrt.f32 %v1340_v14 }
 0x41b   :  { %v1341_v21 = vmax.f32 %v1325_v44, 1e-16 }
 0x41c   :  { %v1253_v12 = vpop.xlane.xlu0 %1252 }
 0x41d   :  { %v1718_v4 = vpop.eup %1717  ;;  %v1323_v17 = vmul.f32 %v1301_v46, %v1253_v12 }
 0x41e   :  { %v1367_v59 = vmul.f32 %v1718_v4, %v1197_v32  ;;  %v1720_v62 = vpop.eup %1719 }
 0x41f   :  { %v1339_v61 = vmax.f32 %v1323_v17, 1e-16  ;;  %v1368_v51 = vmul.f32 %v1720_v62, %v2296_v47  ;;  %v1722_v54 = vpop.eup %1721 }
 0x420   :  { %v1311_v39 = vpop.xlane.xlu0 %1310  ;;  %v1388_v5 = vsel %vm1378_vm0, %v1367_v59, 0.0 }
 0x421   :  { %1727 = vrsqrt.f32 %v1339_v61  ;;  %v1389_v1 = vadd.f32 %v1388_v5, %v1387_v48  ;;  %v1390_v2 = vsel %vm1378_vm0, %v1368_v51, 0.0 }
 0x423   :  { %v1391_v26 = vadd.f32 %v1390_v2, %v1389_v1 }
 0x42a   :  { %v1263_v22 = vpop.xlane.xlu1 %1262 }
 0x42b   :  { %v1328_v20 = vmul.f32 %v1311_v39, %v1263_v22 }
 0x42d   :  { %v1261_v23 = vpop.xlane.xlu0 %1260  ;;  %v1344_v10 = vmax.f32 %v1328_v20, 1e-16 }
 0x42e   :  { %v1259_v46 = vpop.xlane.xlu1 %1258  ;;  %v1327_v41 = vmul.f32 %v2298_v3, %v1261_v23 }
 0x42f   :  { %v1326_v50 = vmul.f32 %v2292_v9, %v1259_v46  ;;  %v1724_v9 = vpop.eup %1723 }
 0x430   :  { %v1343_v57 = vmax.f32 %v1327_v41, 1e-16  ;;  %v1726_v28 = vpop.eup %1725 }
 0x431   :  { %v1342_v53 = vmax.f32 %v1326_v50, 1e-16  ;;  %v1265_v25 = vpop.xlane.xlu0 %1264  ;;  %v1728_v6 = vpop.eup %1727 }
 0x432   :  { %v1201_v7 = vpop.xlane.xlu1 %1200 }
 0x433   :  { %1729 = vrsqrt.f32 %v1342_v53  ;;  %v1369_v13 = vmul.f32 %v1722_v54, %v1201_v7 }
 0x434   :  { %1731 = vrsqrt.f32 %v1341_v21 }
 0x435   :  { %v1392_v60 = vsel %vm1378_vm0, %v1369_v13, 0.0  ;;  %v1203_v19 = vpop.xlane.xlu0 %1202  ;;  %1733 = vrsqrt.f32 %v1344_v10 }
 0x436   :  { %v1370_v3 = vmul.f32 %v1724_v9, %v1203_v19  ;;  %v1313_v27 = vpop.xlane.xlu1 %1312  ;;  %1735 = vrsqrt.f32 %v1343_v57  ;;  %v1393_v8 = vadd.f32 %v1392_v60, %v1391_v26 }
 0x437   :  { %v1329_v47 = vmul.f32 %v1313_v27, %v1265_v25 }
 0x438   :  { %v1394_v29 = vsel %vm1378_vm0, %v1370_v3, 0.0 }
 0x439   :  { %v1345_v49 = vmax.f32 %v1329_v47, 1e-16  ;;  %v1207_v11 = vpop.xlane.xlu0 %1206  ;;  %v1395_v34 = vadd.f32 %v1394_v29, %v1393_v8 }
 0x43a   :  { %v1205_v15 = vpop.xlane.xlu1 %1204  ;;  %v1372_v32 = vmul.f32 %v1726_v28, %v1207_v11 }
 0x43b   :  { %1737 = vrsqrt.f32 %v1345_v49  ;;  %v1371_v16 = vmul.f32 %v1728_v6, %v1205_v15 }
 0x43c   :  { %v1398_v36 = vsel %vm1378_vm0, %v1372_v32, 0.0 }
 0x43d   :  { %v1730_v52 = vpop.eup %1729  ;;  %v1396_v38 = vsel %vm1378_vm0, %v1371_v16, 0.0  ;;  %v1211_v42 = vpop.xlane.xlu0 %1210 }
 0x43e   :  { %v1732_v12 = vpop.eup %1731  ;;  %v1397_v33 = vadd.f32 %v1396_v38, %v1395_v34  ;;  %v1209_v56 = vpop.xlane.xlu1 %1208  ;;  %v1374_v58 = vmul.f32 %v1730_v52, %v1211_v42 }
 0x43f   :  { %v1373_v30 = vmul.f32 %v1732_v12, %v1209_v56  ;;  %v1734_v18 = vpop.eup %1733 }
 0x440   :  { %v1399_v63 = vadd.f32 %v1398_v36, %v1397_v33  ;;  %v1736_v39 = vpop.eup %1735  ;;  %v1402_v35 = vsel %vm1378_vm0, %v1374_v58, 0.0 }
 0x441   :  { %v1400_v24 = vsel %vm1378_vm0, %v1373_v30, 0.0  ;;  %v1215_v43 = vpop.xlane.xlu0 %1214 }
 0x442   :  { %v1401_v4 = vadd.f32 %v1400_v24, %v1399_v63  ;;  %v1213_v17 = vpop.xlane.xlu1 %1212  ;;  %v1376_v55 = vmul.f32 %v1734_v18, %v1215_v43 }
 0x443   :  { %v1375_v40 = vmul.f32 %v1736_v39, %v1213_v17 }
 0x444   :  { %v1403_v0 = vadd.f32 %v1402_v35, %v1401_v4  ;;  %v1406_v31 = vsel %vm1378_vm0, %v1376_v55, 0.0 }
 0x445   :  { %v1738_v22 = vpop.eup %1737  ;;  %v1404_v14 = vsel %vm1378_vm0, %v1375_v40, 0.0  ;;  %v1071_v59 = vpop.xlane.xlu0 %1070 }
 0x446   :  { %v1405_v44 = vadd.f32 %v1404_v14, %v1403_v0  ;;  %v1072_v61 = vrot.slane %v1071_v59, 4  ;;  %v1217_v45 = vpop.xlane.xlu1 %1216 }
 0x447   :  { %v1377_v23 = vmul.f32 %v1738_v22, %v1217_v45 }
 0x448   :  { %v1073_v62 = vadd.f32 %v1072_v61, %v1071_v59  ;;  %v1407_v37 = vadd.f32 %v1406_v31, %v1405_v44 }
 0x449   :  { %v1408_v46 = vsel %vm1378_vm0, %v1377_v23, 0.0 }
 0x44a   :  { %v1074_v20 = vrot.slane %v1073_v62, 2  ;;  %v1161_v50 = vpop.xlane.xlu1 %1160  ;;  %v1409_v5 = vadd.f32 %v1408_v46, %v1407_v37 }
 0x44b   :  { %v1162_v48 = vrot.slane %v1161_v50, 4 }
 0x44c   :  { %1410 = vadd.xlane.f32.xlu0 %v1409_v5  ;;  %v1075_v21 = vadd.f32 %v1074_v20, %v1073_v62 }
 0x44d   :  { %v1163_v41 = vadd.f32 %v1162_v48, %v1161_v50 }
 0x44e   :  { %v1076_v51 = vrot.slane %v1075_v21, 1 }
 0x44f   :  { %v1164_v53 = vrot.slane %v1163_v41, 2 }
 0x450   :  { %v1077_v25 = vadd.f32 %v1076_v51, %v1075_v21 }
 0x451   :  { %v1165_v54 = vadd.f32 %v1164_v53, %v1163_v41 }
 0x452   :  { %1600 = vpush %v1077_v25 }
 0x453   :  { %v1166_v1 = vrot.slane %v1165_v54, 1 }
 0x455   :  { %v1167_v7 = vadd.f32 %v1166_v1, %v1165_v54 }
 0x457   :  { %1602 = vpush %v1167_v7 }
 0x483   :  { %s1601_s2 = spop %1600 }
 0x484   :  { %s1079_s21 = smul.f32 6.1035156e-05, %s1601_s2 }
 0x486   :  { %s1080_s22 = smul.f32 0.02, %s1079_s21 }
 0x488   :  { %1432 = sst [smem:[#allocation7 + $0x3]] %s1080_s22  ;;  %s1603_s23 = spop %1602 }
 0x489   :  { %s1169_s24 = smul.f32 6.1035156e-05, %s1603_s23 }
 0x48b   :  { %s1421_s25 = smul.f32 0.1, %s1169_s24  ;;  %1426 = sst [smem:[#allocation7]] %s1169_s24 }
 0x48d   :  { %1430 = sst [smem:[#allocation7 + $0x2]] %s1421_s25 }
 0x4d9   :  { %v1411_v10 = vpop.xlane.xlu0 %1410 }
 0x4da   :  { %v1412_v13 = vrot.slane %v1411_v10, 4 }
 0x4dc   :  { %v1413_v57 = vadd.f32 %v1412_v13, %v1411_v10 }
 0x4de   :  { %v1414_v9 = vrot.slane %v1413_v57, 2 }
 0x4e0   :  { %v1415_v2 = vadd.f32 %v1414_v9, %v1413_v57 }
 0x4e2   :  { %v1416_v60 = vrot.slane %v1415_v2, 1 }
 0x4e4   :  { %v1417_v19 = vadd.f32 %v1416_v60, %v1415_v2 }
 0x4e6   :  { %1604 = vpush %v1417_v19 }
 0x517   :  { %s1605_s27 = spop %1604 }
 0x518   :  { %s1419_s28 = smul.f32 0.0078125, %s1605_s27 }
 0x51a   :  { %s1420_s29 = ssub.f32 1.0, %s1419_s28 }
 0x51c   :  { %s1422_s30 = sadd.f32 %s1420_s29, %s1169_s24 }
 0x51d   :  { %1428 = sst [smem:[#allocation7 + $0x1]] %s1420_s29 }
 0x51e   :  { %s1423_s5 = sadd.f32 %s1422_s30, %s1421_s25 }
 0x520   :  { %s1424_s6 = sadd.f32 %s1423_s5, %s1080_s22 }
 0x522   :  { %1434 = sst [smem:[#allocation7 + $0x4]] %s1424_s6 }
 0x523   :  { %1797 = shalt.err (!%p1794_p4)
}
 0x524   :  { %s1811_s13 = smov [#allocation7]  }
 0x525   :  { %1448 = dma.smem_to_hbm %s1811_s13, 16, %s2337_s4, [#allocation4]  }
 0x526   :  { %1802 = dma.done.wait [#allocation4], 16  }
 0x527   :  { %1803 = vsyncadd [#allocation4], 4294967280 }
 0x528   :  { %1452 = sfence }
 0x529   :  { %1453 = vsyncpa [#allocation3], 1 }
 0x52a   :  { %1454 = vsyncpa [#allocation6], 1 }
 0x52b   :  { %1455 = vsyncpa [#allocation4], 1 }

</bundles_post_ra>
